<compile_context>
chip_gen: v7x
topology: tpu7x:2x2x1
jax: 0.10.0
libtpu: 0.0.40
codegen_flags: <defaults>
</compile_context>

<pallas_src>
import functools

import jax
import jax.numpy as jnp
from jax import lax
from jax.experimental import pallas as pl
from jax.experimental.pallas import tpu as pltpu


def _encoder_layer_kernel(xf_ref, xq_ref, mask_ref,
                          wq_ref, wkv_ref, wo_ref,
                          w1_ref, b1_ref, w2_ref, b2_ref,
                          g1_ref, be1_ref, g2_ref, be2_ref,
                          out_ref,
                          k_scr, v_scr, x1n_scr, x1nb_scr, acc_scr,
                          *, n_head, d_k, d_v):
    qi = pl.program_id(1)
    fi = pl.program_id(2)
    nf = pl.num_programs(2)

    tq = xq_ref.shape[1]
    seq = mask_ref.shape[2]
    hdk = n_head * d_k
    f32 = jnp.float32
    bf16 = jnp.bfloat16

    # ---- K / V projections for this batch row: once per row (qi==0, fi==0) --
    # Single fused matmul (better MXU N-dim utilisation than two separate ones).
    @pl.when(jnp.logical_and(qi == 0, fi == 0))
    def _project_kv():
        xf = xf_ref[0]                                     # [S, D] bf16
        kv = jnp.dot(xf, wkv_ref[...],
                     preferred_element_type=f32)           # [S, H*dk + H*dv] f32
        k_scr[...] = kv[:, :hdk].astype(bf16)
        v_scr[...] = kv[:, hdk:].astype(bf16)

    # ---- self-attention + residual + LayerNorm1: once per query tile --------
    @pl.when(fi == 0)
    def _attention():
        x_tile = xq_ref[0]                                 # [TQ, D] f32
        xb = x_tile.astype(bf16)

        # Fold 1/sqrt(d_k) into q once instead of scaling each [TQ,S] score.
        q = jnp.dot(xb, wq_ref[...], preferred_element_type=f32)
        q = (q * lax.rsqrt(f32(d_k))).astype(bf16)         # [TQ, H*dk]

        # Hoist the mask out of the head loop as a finite additive bias;
        # broadcast once so it is not re-materialised per head.
        m = mask_ref[0]                                    # [1, S] int32
        bias = jnp.where(m == 1, f32(-1e30), f32(0.0))
        bias = jnp.broadcast_to(bias, (tq, seq))           # [TQ, S]

        acc_scr[...] = jnp.zeros_like(acc_scr)
        # n_head is a small static constant; per-head intermediates die
        # immediately because the partial W_O product is accumulated into VMEM.
        for h in range(n_head):
            qh = q[:, h * d_k:(h + 1) * d_k]               # [TQ, dk] bf16
            kh = k_scr[:, h * d_k:(h + 1) * d_k]           # [S, dk]  bf16
            vh = v_scr[:, h * d_v:(h + 1) * d_v]           # [S, dv]  bf16
            # Contract last dims directly (no explicit kh.T transpose).
            s = lax.dot_general(qh, kh, (((1,), (1,)), ((), ())),
                                preferred_element_type=f32)        # [TQ, S]
            s = s + bias
            s_max = jnp.max(s, axis=-1, keepdims=True)
            p = jnp.exp(s - s_max)
            denom = jnp.sum(p, axis=-1, keepdims=True)
            p = p * pl.reciprocal(denom, approx=True)      # EUP divide
            oh = jnp.dot(p.astype(bf16), vh, preferred_element_type=f32)  # [TQ, dv]
            # Fuse the head output straight into the W_O projection (no concat).
            acc_scr[...] += jnp.dot(oh.astype(bf16),
                                    wo_ref[h * d_v:(h + 1) * d_v, :],
                                    preferred_element_type=f32)    # [TQ, D]

        # Residual + LayerNorm1 (f32 VPU math).
        # TODO(synk): dropout implemented as identity (inference mode).
        x1 = x_tile + acc_scr[...]
        mu = jnp.mean(x1, axis=-1, keepdims=True)
        var = jnp.mean((x1 - mu) ** 2, axis=-1, keepdims=True)
        x1n = ((x1 - mu) * lax.rsqrt(var + 1e-5)
               * g1_ref[...] + be1_ref[...])
        x1n_scr[...] = x1n                                 # f32: final residual
        x1nb_scr[...] = x1n.astype(bf16)                   # bf16: FFN matmul operand
        acc_scr[...] = jnp.zeros_like(acc_scr)             # reset -> FFN accumulator

    # ---- position-wise FFN: streamed over d_ff blocks (every fi step) -------
    h1 = jnp.dot(x1nb_scr[...], w1_ref[...],
                 preferred_element_type=f32) + b1_ref[...]          # [TQ, TFF]
    h1 = jnp.maximum(h1, 0.0)
    acc_scr[...] += jnp.dot(h1.astype(bf16), w2_ref[...],
                            preferred_element_type=f32)             # [TQ, D]

    # ---- residual + LayerNorm2 + writeback: once per query tile -------------
    @pl.when(fi == nf - 1)
    def _finalize():
        x2 = x1n_scr[...] + acc_scr[...] + b2_ref[...]
        mu = jnp.mean(x2, axis=-1, keepdims=True)
        var = jnp.mean((x2 - mu) ** 2, axis=-1, keepdims=True)
        out_ref[0] = ((x2 - mu) * lax.rsqrt(var + 1e-5)
                      * g2_ref[...] + be2_ref[...])


def encoder_layer(x, mask, params, *, n_head, d_k, d_v, tq=None, tff=None):
    """x: [B,S,D] f32, mask: [B,1,S] i32 (1 => masked).  Returns [B,S,D] f32."""
    B, S, D = x.shape
    d_ff = params["w1"].shape[0]
    f32, bf16 = jnp.float32, jnp.bfloat16

    # MXU-friendly default tiles, clipped to the problem size.
    if tq is None:
        tq = min(S, 256)
    if tff is None:
        tff = min(d_ff, 512)
    assert S % tq == 0 and d_ff % tff == 0

    # Pre-transpose PyTorch [out,in] weights so the kernel computes x @ W;
    # cast matmul operands to bf16 (accumulation stays f32 inside the kernel).
    # K and V weights are fused so the per-row projection is one MXU matmul.
    x_bf = x.astype(bf16)
    wq_t = params["wq"].T.astype(bf16)
    wkv_t = jnp.concatenate([params["wk"].T, params["wv"].T], axis=1).astype(bf16)
    wo_t = params["wo"].T.astype(bf16)
    w1_t = params["w1"].T.astype(bf16)
    w2_t = params["w2"].T.astype(bf16)
    b1 = params["b1"].reshape(1, d_ff).astype(f32)
    b2 = params["b2"].reshape(1, D).astype(f32)
    g1 = params["g1"].reshape(1, D).astype(f32)
    be1 = params["be1"].reshape(1, D).astype(f32)
    g2 = params["g2"].reshape(1, D).astype(f32)
    be2 = params["be2"].reshape(1, D).astype(f32)

    def const_spec(arr):
        nd = arr.ndim
        return pl.BlockSpec(arr.shape, lambda b, qi, fi: (0,) * nd)
    # TODO(synk): invariant-weight specs could use pipeline_mode=pl.Buffered(1)
    # (or a one-shot pl.ANY DMA) to avoid double-buffering them on v7x.

    grid = (B, S // tq, d_ff // tff)

    grid_spec = pltpu.PrefetchScalarGridSpec(
        num_scalar_prefetch=0,
        grid=grid,
        in_specs=[
            pl.BlockSpec((1, S, D), lambda b, qi, fi: (b, 0, 0)),    # x full row (bf16)
            pl.BlockSpec((1, tq, D), lambda b, qi, fi: (b, qi, 0)),  # x query tile (f32)
            pl.BlockSpec((1, 1, S), lambda b, qi, fi: (b, 0, 0)),    # mask
            const_spec(wq_t), const_spec(wkv_t), const_spec(wo_t),
            pl.BlockSpec((D, tff), lambda b, qi, fi: (0, fi)),       # W1 d_ff block
            pl.BlockSpec((1, tff), lambda b, qi, fi: (0, fi)),       # b1 d_ff block
            pl.BlockSpec((tff, D), lambda b, qi, fi: (fi, 0)),       # W2 d_ff block
            const_spec(b2),
            const_spec(g1), const_spec(be1), const_spec(g2), const_spec(be2),
        ],
        out_specs=pl.BlockSpec((1, tq, D), lambda b, qi, fi: (b, qi, 0)),
        scratch_shapes=[
            pltpu.VMEM((S, n_head * d_k), bf16),    # K for current batch row
            pltpu.VMEM((S, n_head * d_v), bf16),    # V for current batch row
            pltpu.VMEM((tq, D), f32),               # LayerNorm1 output (f32, lives across fi)
            pltpu.VMEM((tq, D), bf16),              # LayerNorm1 output (bf16 matmul operand)
            pltpu.VMEM((tq, D), f32),               # attention / FFN accumulator
        ],
    )

    kernel = functools.partial(_encoder_layer_kernel,
                               n_head=n_head, d_k=d_k, d_v=d_v)

    return pl.pallas_call(
        kernel,
        out_shape=jax.ShapeDtypeStruct((B, S, D), f32),
        grid_spec=grid_spec,
        compiler_params=pltpu.CompilerParams(
            dimension_semantics=("parallel", "arbitrary", "arbitrary"),
            vmem_limit_bytes=64 * 1024 * 1024,
        ),
    )(x_bf, x, mask, wq_t, wkv_t, wo_t,
      w1_t, b1, w2_t, b2, g1, be1, g2, be2)


# ---------------------------- pure-JAX reference ---------------------------
def encoder_layer_ref(x, mask, params, *, n_head, d_k, d_v):
    """Reference mirroring the kernel's bf16-matmul / f32-accumulate numerics."""
    B, S, D = x.shape
    f32, bf16 = jnp.float32, jnp.bfloat16

    def mm(a, b):
        return jnp.matmul(a.astype(bf16), b.astype(bf16),
                          preferred_element_type=f32)

    q = (mm(x, params["wq"].T) * lax.rsqrt(f32(d_k))).astype(bf16)
    k = mm(x, params["wk"].T).astype(bf16)
    v = mm(x, params["wv"].T).astype(bf16)
    q = q.reshape(B, S, n_head, d_k).transpose(0, 2, 1, 3)
    k = k.reshape(B, S, n_head, d_k).transpose(0, 2, 1, 3)
    v = v.reshape(B, S, n_head, d_v).transpose(0, 2, 1, 3)

    s = jnp.einsum("bhqd,bhkd->bhqk", q, k, preferred_element_type=f32)
    s = s + jnp.where(mask[:, None, :, :] == 1, f32(-1e30), f32(0.0))
    p = jax.nn.softmax(s, axis=-1)
    o = jnp.einsum("bhqk,bhkd->bhqd", p.astype(bf16), v,
                   preferred_element_type=f32)
    o = o.transpose(0, 2, 1, 3).reshape(B, S, n_head * d_v)
    attn_out = mm(o, params["wo"].T)

    def ln(y, g, b):
        mu = jnp.mean(y, axis=-1, keepdims=True)
        var = jnp.mean((y - mu) ** 2, axis=-1, keepdims=True)
        return (y - mu) * lax.rsqrt(var + 1e-5) * g + b

    x1 = ln(x + attn_out, params["g1"], params["be1"])
    h1 = jnp.maximum(mm(x1, params["w1"].T) + params["b1"], 0.0)
    ff = mm(h1, params["w2"].T) + params["b2"]
    return ln(x1 + ff, params["g2"], params["be2"])


if __name__ == "__main__":
    B, S = 2, 8
    d_model, n_head, d_k, d_v, d_ff = 32, 4, 8, 8, 64

    key = jax.random.PRNGKey(0)
    ks = jax.random.split(key, 15)

    params = {
        "wq": 0.1 * jax.random.normal(ks[0], (n_head * d_k, d_model), jnp.float32),
        "wk": 0.1 * jax.random.normal(ks[1], (n_head * d_k, d_model), jnp.float32),
        "wv": 0.1 * jax.random.normal(ks[2], (n_head * d_v, d_model), jnp.float32),
        "wo": 0.1 * jax.random.normal(ks[3], (d_model, n_head * d_v), jnp.float32),
        "w1": 0.1 * jax.random.normal(ks[4], (d_ff, d_model), jnp.float32),
        "b1": 0.1 * jax.random.normal(ks[5], (d_ff,), jnp.float32),
        "w2": 0.1 * jax.random.normal(ks[6], (d_model, d_ff), jnp.float32),
        "b2": 0.1 * jax.random.normal(ks[7], (d_model,), jnp.float32),
        "g1": 1.0 + 0.05 * jax.random.normal(ks[8], (d_model,), jnp.float32),
        "be1": 0.05 * jax.random.normal(ks[9], (d_model,), jnp.float32),
        "g2": 1.0 + 0.05 * jax.random.normal(ks[10], (d_model,), jnp.float32),
        "be2": 0.05 * jax.random.normal(ks[11], (d_model,), jnp.float32),
    }

    x = jax.random.normal(ks[12], (B, S, d_model), jnp.float32)
    # mask: 1 = masked. Keep the first position unmasked per batch row.
    mask = (jax.random.uniform(ks[13], (B, 1, S)) < 0.3).astype(jnp.int32)
    mask = mask.at[:, :, 0].set(0)

    out = encoder_layer(x, mask, params, n_head=n_head, d_k=d_k, d_v=d_v)
    out = jax.block_until_ready(out)

    ref = encoder_layer_ref(x, mask, params, n_head=n_head, d_k=d_k, d_v=d_v)
    max_diff = float(jnp.max(jnp.abs(out - ref)))
    # bf16 MXU operands + approx-reciprocal softmax vs exact reference divide.
    assert jnp.allclose(out, ref, atol=1e-2, rtol=1e-2), max_diff

    print("KERNEL_OK")
</pallas_src>

<mosaic_0001>
module attributes {stable_mosaic.version = 11 : i64} {
  func.func @_encoder_layer_kernel(%arg0: i32, %arg1: i32, %arg2: i32, %arg3: memref<1x8x32xbf16, #tpu.memory_space<vmem>>, %arg4: memref<1x8x32xf32, #tpu.memory_space<vmem>>, %arg5: memref<1x1x8xi32, #tpu.memory_space<vmem>>, %arg6: memref<32x32xbf16, #tpu.memory_space<vmem>>, %arg7: memref<32x64xbf16, #tpu.memory_space<vmem>>, %arg8: memref<32x32xbf16, #tpu.memory_space<vmem>>, %arg9: memref<32x64xbf16, #tpu.memory_space<vmem>>, %arg10: memref<1x64xf32, #tpu.memory_space<vmem>>, %arg11: memref<64x32xbf16, #tpu.memory_space<vmem>>, %arg12: memref<1x32xf32, #tpu.memory_space<vmem>>, %arg13: memref<1x32xf32, #tpu.memory_space<vmem>>, %arg14: memref<1x32xf32, #tpu.memory_space<vmem>>, %arg15: memref<1x32xf32, #tpu.memory_space<vmem>>, %arg16: memref<1x32xf32, #tpu.memory_space<vmem>>, %arg17: memref<1x8x32xf32, #tpu.memory_space<vmem>>, %arg18: memref<8x32xbf16, #tpu.memory_space<vmem>>, %arg19: memref<8x32xbf16, #tpu.memory_space<vmem>>, %arg20: memref<8x32xf32, #tpu.memory_space<vmem>>, %arg21: memref<8x32xbf16, #tpu.memory_space<vmem>>, %arg22: memref<8x32xf32, #tpu.memory_space<vmem>>) attributes {dimension_semantics = [#tpu.dimension_semantics<parallel>, #tpu.dimension_semantics<arbitrary>, #tpu.dimension_semantics<arbitrary>], iteration_bounds = array<i64: 2, 1, 1>, scalar_prefetch = 0 : i64, scratch_operands = 5 : i64, tpu.core_type = #tpu.core_type<tc>, window_params = [{transform_indices = @transform_0, window_bounds = array<i64: 1, 8, 32>}, {transform_indices = @transform_1, window_bounds = array<i64: 1, 8, 32>}, {transform_indices = @transform_2, window_bounds = array<i64: 1, 1, 8>}, {pipeline_mode = #tpu.pipeline_mode<synchronous>, transform_indices = @transform_3, window_bounds = array<i64: 32, 32>}, {pipeline_mode = #tpu.pipeline_mode<synchronous>, transform_indices = @transform_4, window_bounds = array<i64: 32, 64>}, {pipeline_mode = #tpu.pipeline_mode<synchronous>, transform_indices = @transform_5, window_bounds = array<i64: 32, 32>}, {transform_indices = @transform_6, window_bounds = array<i64: 32, 64>}, {transform_indices = @transform_7, window_bounds = array<i64: 1, 64>}, {transform_indices = @transform_8, window_bounds = array<i64: 64, 32>}, {pipeline_mode = #tpu.pipeline_mode<synchronous>, transform_indices = @transform_9, window_bounds = array<i64: 1, 32>}, {pipeline_mode = #tpu.pipeline_mode<synchronous>, transform_indices = @transform_10, window_bounds = array<i64: 1, 32>}, {pipeline_mode = #tpu.pipeline_mode<synchronous>, transform_indices = @transform_11, window_bounds = array<i64: 1, 32>}, {pipeline_mode = #tpu.pipeline_mode<synchronous>, transform_indices = @transform_12, window_bounds = array<i64: 1, 32>}, {pipeline_mode = #tpu.pipeline_mode<synchronous>, transform_indices = @transform_13, window_bounds = array<i64: 1, 32>}, {transform_indices = @transform_14, window_bounds = array<i64: 1, 8, 32>}]} {
    %c0_i32 = arith.constant 0 : i32
    %0 = arith.cmpi eq, %arg1, %c0_i32 : i32
    %c0_i32_0 = arith.constant 0 : i32
    %1 = arith.cmpi eq, %arg2, %c0_i32_0 : i32
    %2 = arith.andi %0, %1 : i1
    %3 = arith.extui %2 : i1 to i32
    %c0_i32_1 = arith.constant 0 : i32
    %4 = arith.cmpi ne, %3, %c0_i32_1 : i32
    scf.if %4 {
      %c0_19 = arith.constant 0 : index
      %c0_20 = arith.constant 0 : index
      %c0_21 = arith.constant 0 : index
      %25 = vector.load %arg3[%c0_19, %c0_20, %c0_21] : memref<1x8x32xbf16, #tpu.memory_space<vmem>>, vector<1x8x32xbf16>
      %26 = vector.shape_cast %25 : vector<1x8x32xbf16> to vector<8x32xbf16>
      %c0_22 = arith.constant 0 : index
      %c0_23 = arith.constant 0 : index
      %27 = vector.load %arg7[%c0_22, %c0_23] : memref<32x64xbf16, #tpu.memory_space<vmem>>, vector<32x64xbf16>
      %cst_24 = arith.constant dense<0.000000e+00> : vector<8x64xf32>
      %28 = tpu.matmul %26, %27, %cst_24 {dimension_numbers = #tpu.dot_dimension_numbers<[1], [0], [0], [1], [0, 0, 1, 1], [], []>} : vector<8x32xbf16>, vector<32x64xbf16>, vector<8x64xf32> -> vector<8x64xf32>
      %29 = vector.extract_strided_slice %28 {offsets = [0, 0], sizes = [8, 32], strides = [1, 1]} : vector<8x64xf32> to vector<8x32xf32>
      %30 = arith.truncf %29 : vector<8x32xf32> to vector<8x32xbf16>
      %c0_25 = arith.constant 0 : index
      %c0_26 = arith.constant 0 : index
      %31 = vector.load %arg18[%c0_25, %c0_26] : memref<8x32xbf16, #tpu.memory_space<vmem>>, vector<8x32xbf16>
      tpu.vector_store %arg18[%c0_25, %c0_26], %30 {strides = array<i32>} : memref<8x32xbf16, #tpu.memory_space<vmem>>, vector<8x32xbf16>,
      %32 = vector.extract_strided_slice %28 {offsets = [0, 32], sizes = [8, 32], strides = [1, 1]} : vector<8x64xf32> to vector<8x32xf32>
      %33 = arith.truncf %32 : vector<8x32xf32> to vector<8x32xbf16>
      %c0_27 = arith.constant 0 : index
      %c0_28 = arith.constant 0 : index
      %34 = vector.load %arg19[%c0_27, %c0_28] : memref<8x32xbf16, #tpu.memory_space<vmem>>, vector<8x32xbf16>
      tpu.vector_store %arg19[%c0_27, %c0_28], %33 {strides = array<i32>} : memref<8x32xbf16, #tpu.memory_space<vmem>>, vector<8x32xbf16>,
    } else {
    }
    %c0_i32_2 = arith.constant 0 : i32
    %5 = arith.cmpi eq, %arg2, %c0_i32_2 : i32
    %6 = arith.extui %5 : i1 to i32
    %c0_i32_3 = arith.constant 0 : i32
    %7 = arith.cmpi ne, %6, %c0_i32_3 : i32
    scf.if %7 {
      %c0_19 = arith.constant 0 : index
      %c0_20 = arith.constant 0 : index
      %c0_21 = arith.constant 0 : index
      %25 = vector.load %arg4[%c0_19, %c0_20, %c0_21] : memref<1x8x32xf32, #tpu.memory_space<vmem>>, vector<1x8x32xf32>
      %26 = vector.shape_cast %25 : vector<1x8x32xf32> to vector<8x32xf32>
      %27 = arith.truncf %26 : vector<8x32xf32> to vector<8x32xbf16>
      %c0_22 = arith.constant 0 : index
      %c0_23 = arith.constant 0 : index
      %28 = vector.load %arg6[%c0_22, %c0_23] : memref<32x32xbf16, #tpu.memory_space<vmem>>, vector<32x32xbf16>
      %cst_24 = arith.constant dense<0.000000e+00> : vector<8x32xf32>
      %29 = tpu.matmul %27, %28, %cst_24 {dimension_numbers = #tpu.dot_dimension_numbers<[1], [0], [0], [1], [0, 0, 1, 1], [], []>} : vector<8x32xbf16>, vector<32x32xbf16>, vector<8x32xf32> -> vector<8x32xf32>
      %cst_25 = arith.constant 8.000000e+00 : f32
      %30 = math.rsqrt %cst_25 : f32
      %31 = vector.broadcast %30 : f32 to vector<8x32xf32>
      %32 = arith.mulf %29, %31 : vector<8x32xf32>
      %33 = arith.truncf %32 : vector<8x32xf32> to vector<8x32xbf16>
      %c0_26 = arith.constant 0 : index
      %c0_27 = arith.constant 0 : index
      %c0_28 = arith.constant 0 : index
      %34 = vector.load %arg5[%c0_26, %c0_27, %c0_28] : memref<1x1x8xi32, #tpu.memory_space<vmem>>, vector<1x1x8xi32>
      %35 = vector.shape_cast %34 : vector<1x1x8xi32> to vector<1x8xi32>
      %c1_i32 = arith.constant 1 : i32
      %36 = vector.broadcast %c1_i32 : i32 to vector<1x8xi32>
      %37 = arith.cmpi eq, %35, %36 : vector<1x8xi32>
      %cst_29 = arith.constant -1.000000e+30 : f32
      %cst_30 = arith.constant 0.000000e+00 : f32
      %38 = vector.broadcast %cst_29 : f32 to vector<1x8xf32>
      %39 = vector.broadcast %cst_30 : f32 to vector<1x8xf32>
      %40 = arith.select %37, %38, %39 : vector<1x8xi1>, vector<1x8xf32>
      %41 = vector.shape_cast %40 : vector<1x8xf32> to vector<1x8xf32>
      %42 = vector.broadcast %41 : vector<1x8xf32> to vector<8x8xf32>
      %cst_31 = arith.constant 0.000000e+00 : f32
      %43 = vector.broadcast %cst_31 : f32 to vector<8x32xf32>
      %c0_32 = arith.constant 0 : index
      %c0_33 = arith.constant 0 : index
      %44 = vector.load %arg22[%c0_32, %c0_33] : memref<8x32xf32, #tpu.memory_space<vmem>>, vector<8x32xf32>
      tpu.vector_store %arg22[%c0_32, %c0_33], %43 {strides = array<i32>} : memref<8x32xf32, #tpu.memory_space<vmem>>, vector<8x32xf32>,
      %45 = vector.extract_strided_slice %33 {offsets = [0, 0], sizes = [8, 8], strides = [1, 1]} : vector<8x32xbf16> to vector<8x8xbf16>
      %c0_34 = arith.constant 0 : index
      %c0_35 = arith.constant 0 : index
      %46 = vector.load %arg18[%c0_34, %c0_35] : memref<8x32xbf16, #tpu.memory_space<vmem>>, vector<8x8xbf16>
      %c0_36 = arith.constant 0 : index
      %c0_37 = arith.constant 0 : index
      %47 = vector.load %arg19[%c0_36, %c0_37] : memref<8x32xbf16, #tpu.memory_space<vmem>>, vector<8x8xbf16>
      %cst_38 = arith.constant dense<0.000000e+00> : vector<8x8xf32>
      %48 = tpu.matmul %45, %46, %cst_38 {dimension_numbers = #tpu.dot_dimension_numbers<[1], [1], [0], [0], [0, 0, 1, 0], [], []>} : vector<8x8xbf16>, vector<8x8xbf16>, vector<8x8xf32> -> vector<8x8xf32>
      %49 = arith.addf %48, %42 : vector<8x8xf32>
      %cst_39 = arith.constant dense<0xFF800000> : vector<8xf32>
      %50 = vector.multi_reduction <maximumf>, %49, %cst_39 [1] : vector<8x8xf32> to vector<8xf32>
      %51 = vector.shape_cast %50 : vector<8xf32> to vector<8x1xf32>
      %52 = vector.broadcast %51 : vector<8x1xf32> to vector<8x8xf32>
      %53 = arith.subf %49, %52 : vector<8x8xf32>
      %54 = math.exp %53 : vector<8x8xf32>
      %cst_40 = arith.constant dense<0.000000e+00> : vector<8xf32>
      %55 = vector.multi_reduction <add>, %54, %cst_40 [1] : vector<8x8xf32> to vector<8xf32>
      %56 = vector.shape_cast %55 : vector<8xf32> to vector<8x1xf32>
      %57 = tpu.reciprocal %56 {approx = true} : vector<8x1xf32> -> vector<8x1xf32>
      %58 = vector.broadcast %57 : vector<8x1xf32> to vector<8x8xf32>
      %59 = arith.mulf %54, %58 : vector<8x8xf32>
      %60 = arith.truncf %59 : vector<8x8xf32> to vector<8x8xbf16>
      %cst_41 = arith.constant dense<0.000000e+00> : vector<8x8xf32>
      %61 = tpu.matmul %60, %47, %cst_41 {dimension_numbers = #tpu.dot_dimension_numbers<[1], [0], [0], [1], [0, 0, 1, 1], [], []>} : vector<8x8xbf16>, vector<8x8xbf16>, vector<8x8xf32> -> vector<8x8xf32>
      %c0_42 = arith.constant 0 : index
      %c0_43 = arith.constant 0 : index
      %62 = vector.load %arg22[%c0_42, %c0_43] : memref<8x32xf32, #tpu.memory_space<vmem>>, vector<8x32xf32>
      %63 = arith.truncf %61 : vector<8x8xf32> to vector<8x8xbf16>
      %c0_44 = arith.constant 0 : index
      %c0_45 = arith.constant 0 : index
      %64 = vector.load %arg8[%c0_44, %c0_45] : memref<32x32xbf16, #tpu.memory_space<vmem>>, vector<8x32xbf16>
      %cst_46 = arith.constant dense<0.000000e+00> : vector<8x32xf32>
      %65 = tpu.matmul %63, %64, %cst_46 {dimension_numbers = #tpu.dot_dimension_numbers<[1], [0], [0], [1], [0, 0, 1, 1], [], []>} : vector<8x8xbf16>, vector<8x32xbf16>, vector<8x32xf32> -> vector<8x32xf32>
      %66 = arith.addf %62, %65 : vector<8x32xf32>
      %c0_47 = arith.constant 0 : index
      %c0_48 = arith.constant 0 : index
      %67 = vector.load %arg22[%c0_47, %c0_48] : memref<8x32xf32, #tpu.memory_space<vmem>>, vector<8x32xf32>
      tpu.vector_store %arg22[%c0_47, %c0_48], %66 {strides = array<i32>} : memref<8x32xf32, #tpu.memory_space<vmem>>, vector<8x32xf32>,
      %68 = vector.extract_strided_slice %33 {offsets = [0, 8], sizes = [8, 8], strides = [1, 1]} : vector<8x32xbf16> to vector<8x8xbf16>
      %c0_49 = arith.constant 0 : index
      %c8 = arith.constant 8 : index
      %69 = vector.load %arg18[%c0_49, %c8] : memref<8x32xbf16, #tpu.memory_space<vmem>>, vector<8x8xbf16>
      %c0_50 = arith.constant 0 : index
      %c8_51 = arith.constant 8 : index
      %70 = vector.load %arg19[%c0_50, %c8_51] : memref<8x32xbf16, #tpu.memory_space<vmem>>, vector<8x8xbf16>
      %cst_52 = arith.constant dense<0.000000e+00> : vector<8x8xf32>
      %71 = tpu.matmul %68, %69, %cst_52 {dimension_numbers = #tpu.dot_dimension_numbers<[1], [1], [0], [0], [0, 0, 1, 0], [], []>} : vector<8x8xbf16>, vector<8x8xbf16>, vector<8x8xf32> -> vector<8x8xf32>
      %72 = arith.addf %71, %42 : vector<8x8xf32>
      %cst_53 = arith.constant dense<0xFF800000> : vector<8xf32>
      %73 = vector.multi_reduction <maximumf>, %72, %cst_53 [1] : vector<8x8xf32> to vector<8xf32>
      %74 = vector.shape_cast %73 : vector<8xf32> to vector<8x1xf32>
      %75 = vector.broadcast %74 : vector<8x1xf32> to vector<8x8xf32>
      %76 = arith.subf %72, %75 : vector<8x8xf32>
      %77 = math.exp %76 : vector<8x8xf32>
      %cst_54 = arith.constant dense<0.000000e+00> : vector<8xf32>
      %78 = vector.multi_reduction <add>, %77, %cst_54 [1] : vector<8x8xf32> to vector<8xf32>
      %79 = vector.shape_cast %78 : vector<8xf32> to vector<8x1xf32>
      %80 = tpu.reciprocal %79 {approx = true} : vector<8x1xf32> -> vector<8x1xf32>
      %81 = vector.broadcast %80 : vector<8x1xf32> to vector<8x8xf32>
      %82 = arith.mulf %77, %81 : vector<8x8xf32>
      %83 = arith.truncf %82 : vector<8x8xf32> to vector<8x8xbf16>
      %cst_55 = arith.constant dense<0.000000e+00> : vector<8x8xf32>
      %84 = tpu.matmul %83, %70, %cst_55 {dimension_numbers = #tpu.dot_dimension_numbers<[1], [0], [0], [1], [0, 0, 1, 1], [], []>} : vector<8x8xbf16>, vector<8x8xbf16>, vector<8x8xf32> -> vector<8x8xf32>
      %c0_56 = arith.constant 0 : index
      %c0_57 = arith.constant 0 : index
      %85 = vector.load %arg22[%c0_56, %c0_57] : memref<8x32xf32, #tpu.memory_space<vmem>>, vector<8x32xf32>
      %86 = arith.truncf %84 : vector<8x8xf32> to vector<8x8xbf16>
      %c8_58 = arith.constant 8 : index
      %c0_59 = arith.constant 0 : index
      %87 = vector.load %arg8[%c8_58, %c0_59] : memref<32x32xbf16, #tpu.memory_space<vmem>>, vector<8x32xbf16>
      %cst_60 = arith.constant dense<0.000000e+00> : vector<8x32xf32>
      %88 = tpu.matmul %86, %87, %cst_60 {dimension_numbers = #tpu.dot_dimension_numbers<[1], [0], [0], [1], [0, 0, 1, 1], [], []>} : vector<8x8xbf16>, vector<8x32xbf16>, vector<8x32xf32> -> vector<8x32xf32>
      %89 = arith.addf %85, %88 : vector<8x32xf32>
      %c0_61 = arith.constant 0 : index
      %c0_62 = arith.constant 0 : index
      %90 = vector.load %arg22[%c0_61, %c0_62] : memref<8x32xf32, #tpu.memory_space<vmem>>, vector<8x32xf32>
      tpu.vector_store %arg22[%c0_61, %c0_62], %89 {strides = array<i32>} : memref<8x32xf32, #tpu.memory_space<vmem>>, vector<8x32xf32>,
      %91 = vector.extract_strided_slice %33 {offsets = [0, 16], sizes = [8, 8], strides = [1, 1]} : vector<8x32xbf16> to vector<8x8xbf16>
      %c0_63 = arith.constant 0 : index
      %c16 = arith.constant 16 : index
      %92 = vector.load %arg18[%c0_63, %c16] : memref<8x32xbf16, #tpu.memory_space<vmem>>, vector<8x8xbf16>
      %c0_64 = arith.constant 0 : index
      %c16_65 = arith.constant 16 : index
      %93 = vector.load %arg19[%c0_64, %c16_65] : memref<8x32xbf16, #tpu.memory_space<vmem>>, vector<8x8xbf16>
      %cst_66 = arith.constant dense<0.000000e+00> : vector<8x8xf32>
      %94 = tpu.matmul %91, %92, %cst_66 {dimension_numbers = #tpu.dot_dimension_numbers<[1], [1], [0], [0], [0, 0, 1, 0], [], []>} : vector<8x8xbf16>, vector<8x8xbf16>, vector<8x8xf32> -> vector<8x8xf32>
      %95 = arith.addf %94, %42 : vector<8x8xf32>
      %cst_67 = arith.constant dense<0xFF800000> : vector<8xf32>
      %96 = vector.multi_reduction <maximumf>, %95, %cst_67 [1] : vector<8x8xf32> to vector<8xf32>
      %97 = vector.shape_cast %96 : vector<8xf32> to vector<8x1xf32>
      %98 = vector.broadcast %97 : vector<8x1xf32> to vector<8x8xf32>
      %99 = arith.subf %95, %98 : vector<8x8xf32>
      %100 = math.exp %99 : vector<8x8xf32>
      %cst_68 = arith.constant dense<0.000000e+00> : vector<8xf32>
      %101 = vector.multi_reduction <add>, %100, %cst_68 [1] : vector<8x8xf32> to vector<8xf32>
      %102 = vector.shape_cast %101 : vector<8xf32> to vector<8x1xf32>
      %103 = tpu.reciprocal %102 {approx = true} : vector<8x1xf32> -> vector<8x1xf32>
      %104 = vector.broadcast %103 : vector<8x1xf32> to vector<8x8xf32>
      %105 = arith.mulf %100, %104 : vector<8x8xf32>
      %106 = arith.truncf %105 : vector<8x8xf32> to vector<8x8xbf16>
      %cst_69 = arith.constant dense<0.000000e+00> : vector<8x8xf32>
      %107 = tpu.matmul %106, %93, %cst_69 {dimension_numbers = #tpu.dot_dimension_numbers<[1], [0], [0], [1], [0, 0, 1, 1], [], []>} : vector<8x8xbf16>, vector<8x8xbf16>, vector<8x8xf32> -> vector<8x8xf32>
      %c0_70 = arith.constant 0 : index
      %c0_71 = arith.constant 0 : index
      %108 = vector.load %arg22[%c0_70, %c0_71] : memref<8x32xf32, #tpu.memory_space<vmem>>, vector<8x32xf32>
      %109 = arith.truncf %107 : vector<8x8xf32> to vector<8x8xbf16>
      %c16_72 = arith.constant 16 : index
      %c0_73 = arith.constant 0 : index
      %110 = vector.load %arg8[%c16_72, %c0_73] : memref<32x32xbf16, #tpu.memory_space<vmem>>, vector<8x32xbf16>
      %cst_74 = arith.constant dense<0.000000e+00> : vector<8x32xf32>
      %111 = tpu.matmul %109, %110, %cst_74 {dimension_numbers = #tpu.dot_dimension_numbers<[1], [0], [0], [1], [0, 0, 1, 1], [], []>} : vector<8x8xbf16>, vector<8x32xbf16>, vector<8x32xf32> -> vector<8x32xf32>
      %112 = arith.addf %108, %111 : vector<8x32xf32>
      %c0_75 = arith.constant 0 : index
      %c0_76 = arith.constant 0 : index
      %113 = vector.load %arg22[%c0_75, %c0_76] : memref<8x32xf32, #tpu.memory_space<vmem>>, vector<8x32xf32>
      tpu.vector_store %arg22[%c0_75, %c0_76], %112 {strides = array<i32>} : memref<8x32xf32, #tpu.memory_space<vmem>>, vector<8x32xf32>,
      %114 = vector.extract_strided_slice %33 {offsets = [0, 24], sizes = [8, 8], strides = [1, 1]} : vector<8x32xbf16> to vector<8x8xbf16>
      %c0_77 = arith.constant 0 : index
      %c24 = arith.constant 24 : index
      %115 = vector.load %arg18[%c0_77, %c24] : memref<8x32xbf16, #tpu.memory_space<vmem>>, vector<8x8xbf16>
      %c0_78 = arith.constant 0 : index
      %c24_79 = arith.constant 24 : index
      %116 = vector.load %arg19[%c0_78, %c24_79] : memref<8x32xbf16, #tpu.memory_space<vmem>>, vector<8x8xbf16>
      %cst_80 = arith.constant dense<0.000000e+00> : vector<8x8xf32>
      %117 = tpu.matmul %114, %115, %cst_80 {dimension_numbers = #tpu.dot_dimension_numbers<[1], [1], [0], [0], [0, 0, 1, 0], [], []>} : vector<8x8xbf16>, vector<8x8xbf16>, vector<8x8xf32> -> vector<8x8xf32>
      %118 = arith.addf %117, %42 : vector<8x8xf32>
      %cst_81 = arith.constant dense<0xFF800000> : vector<8xf32>
      %119 = vector.multi_reduction <maximumf>, %118, %cst_81 [1] : vector<8x8xf32> to vector<8xf32>
      %120 = vector.shape_cast %119 : vector<8xf32> to vector<8x1xf32>
      %121 = vector.broadcast %120 : vector<8x1xf32> to vector<8x8xf32>
      %122 = arith.subf %118, %121 : vector<8x8xf32>
      %123 = math.exp %122 : vector<8x8xf32>
      %cst_82 = arith.constant dense<0.000000e+00> : vector<8xf32>
      %124 = vector.multi_reduction <add>, %123, %cst_82 [1] : vector<8x8xf32> to vector<8xf32>
      %125 = vector.shape_cast %124 : vector<8xf32> to vector<8x1xf32>
      %126 = tpu.reciprocal %125 {approx = true} : vector<8x1xf32> -> vector<8x1xf32>
      %127 = vector.broadcast %126 : vector<8x1xf32> to vector<8x8xf32>
      %128 = arith.mulf %123, %127 : vector<8x8xf32>
      %129 = arith.truncf %128 : vector<8x8xf32> to vector<8x8xbf16>
      %cst_83 = arith.constant dense<0.000000e+00> : vector<8x8xf32>
      %130 = tpu.matmul %129, %116, %cst_83 {dimension_numbers = #tpu.dot_dimension_numbers<[1], [0], [0], [1], [0, 0, 1, 1], [], []>} : vector<8x8xbf16>, vector<8x8xbf16>, vector<8x8xf32> -> vector<8x8xf32>
      %c0_84 = arith.constant 0 : index
      %c0_85 = arith.constant 0 : index
      %131 = vector.load %arg22[%c0_84, %c0_85] : memref<8x32xf32, #tpu.memory_space<vmem>>, vector<8x32xf32>
      %132 = arith.truncf %130 : vector<8x8xf32> to vector<8x8xbf16>
      %c24_86 = arith.constant 24 : index
      %c0_87 = arith.constant 0 : index
      %133 = vector.load %arg8[%c24_86, %c0_87] : memref<32x32xbf16, #tpu.memory_space<vmem>>, vector<8x32xbf16>
      %cst_88 = arith.constant dense<0.000000e+00> : vector<8x32xf32>
      %134 = tpu.matmul %132, %133, %cst_88 {dimension_numbers = #tpu.dot_dimension_numbers<[1], [0], [0], [1], [0, 0, 1, 1], [], []>} : vector<8x8xbf16>, vector<8x32xbf16>, vector<8x32xf32> -> vector<8x32xf32>
      %135 = arith.addf %131, %134 : vector<8x32xf32>
      %c0_89 = arith.constant 0 : index
      %c0_90 = arith.constant 0 : index
      %136 = vector.load %arg22[%c0_89, %c0_90] : memref<8x32xf32, #tpu.memory_space<vmem>>, vector<8x32xf32>
      tpu.vector_store %arg22[%c0_89, %c0_90], %135 {strides = array<i32>} : memref<8x32xf32, #tpu.memory_space<vmem>>, vector<8x32xf32>,
      %c0_91 = arith.constant 0 : index
      %c0_92 = arith.constant 0 : index
      %137 = vector.load %arg22[%c0_91, %c0_92] : memref<8x32xf32, #tpu.memory_space<vmem>>, vector<8x32xf32>
      %138 = arith.addf %26, %137 : vector<8x32xf32>
      %cst_93 = arith.constant dense<0.000000e+00> : vector<8xf32>
      %139 = vector.multi_reduction <add>, %138, %cst_93 [1] : vector<8x32xf32> to vector<8xf32>
      %140 = vector.shape_cast %139 : vector<8xf32> to vector<8x1xf32>
      %cst_94 = arith.constant 3.200000e+01 : f32
      %141 = vector.broadcast %cst_94 : f32 to vector<8x1xf32>
      %142 = arith.divf %140, %141 : vector<8x1xf32>
      %143 = vector.broadcast %142 : vector<8x1xf32> to vector<8x32xf32>
      %144 = arith.subf %138, %143 : vector<8x32xf32>
      %145 = arith.mulf %144, %144 : vector<8x32xf32>
      %cst_95 = arith.constant dense<0.000000e+00> : vector<8xf32>
      %146 = vector.multi_reduction <add>, %145, %cst_95 [1] : vector<8x32xf32> to vector<8xf32>
      %147 = vector.shape_cast %146 : vector<8xf32> to vector<8x1xf32>
      %cst_96 = arith.constant 3.200000e+01 : f32
      %148 = vector.broadcast %cst_96 : f32 to vector<8x1xf32>
      %149 = arith.divf %147, %148 : vector<8x1xf32>
      %150 = vector.broadcast %142 : vector<8x1xf32> to vector<8x32xf32>
      %151 = arith.subf %138, %150 : vector<8x32xf32>
      %cst_97 = arith.constant 9.99999974E-6 : f32
      %152 = vector.broadcast %cst_97 : f32 to vector<8x1xf32>
      %153 = arith.addf %149, %152 : vector<8x1xf32>
      %154 = math.rsqrt %153 : vector<8x1xf32>
      %155 = vector.broadcast %154 : vector<8x1xf32> to vector<8x32xf32>
      %156 = arith.mulf %151, %155 : vector<8x32xf32>
      %c0_98 = arith.constant 0 : index
      %c0_99 = arith.constant 0 : index
      %157 = vector.load %arg13[%c0_98, %c0_99] : memref<1x32xf32, #tpu.memory_space<vmem>>, vector<1x32xf32>
      %158 = vector.broadcast %157 : vector<1x32xf32> to vector<8x32xf32>
      %159 = arith.mulf %156, %158 : vector<8x32xf32>
      %c0_100 = arith.constant 0 : index
      %c0_101 = arith.constant 0 : index
      %160 = vector.load %arg14[%c0_100, %c0_101] : memref<1x32xf32, #tpu.memory_space<vmem>>, vector<1x32xf32>
      %161 = vector.broadcast %160 : vector<1x32xf32> to vector<8x32xf32>
      %162 = arith.addf %159, %161 : vector<8x32xf32>
      %c0_102 = arith.constant 0 : index
      %c0_103 = arith.constant 0 : index
      %163 = vector.load %arg20[%c0_102, %c0_103] : memref<8x32xf32, #tpu.memory_space<vmem>>, vector<8x32xf32>
      tpu.vector_store %arg20[%c0_102, %c0_103], %162 {strides = array<i32>} : memref<8x32xf32, #tpu.memory_space<vmem>>, vector<8x32xf32>,
      %164 = arith.truncf %162 : vector<8x32xf32> to vector<8x32xbf16>
      %c0_104 = arith.constant 0 : index
      %c0_105 = arith.constant 0 : index
      %165 = vector.load %arg21[%c0_104, %c0_105] : memref<8x32xbf16, #tpu.memory_space<vmem>>, vector<8x32xbf16>
      tpu.vector_store %arg21[%c0_104, %c0_105], %164 {strides = array<i32>} : memref<8x32xbf16, #tpu.memory_space<vmem>>, vector<8x32xbf16>,
      %cst_106 = arith.constant 0.000000e+00 : f32
      %166 = vector.broadcast %cst_106 : f32 to vector<8x32xf32>
      %c0_107 = arith.constant 0 : index
      %c0_108 = arith.constant 0 : index
      %167 = vector.load %arg22[%c0_107, %c0_108] : memref<8x32xf32, #tpu.memory_space<vmem>>, vector<8x32xf32>
      tpu.vector_store %arg22[%c0_107, %c0_108], %166 {strides = array<i32>} : memref<8x32xf32, #tpu.memory_space<vmem>>, vector<8x32xf32>,
    } else {
    }
    %c0 = arith.constant 0 : index
    %c0_4 = arith.constant 0 : index
    %8 = vector.load %arg21[%c0, %c0_4] : memref<8x32xbf16, #tpu.memory_space<vmem>>, vector<8x32xbf16>
    %c0_5 = arith.constant 0 : index
    %c0_6 = arith.constant 0 : index
    %9 = vector.load %arg9[%c0_5, %c0_6] : memref<32x64xbf16, #tpu.memory_space<vmem>>, vector<32x64xbf16>
    %cst = arith.constant dense<0.000000e+00> : vector<8x64xf32>
    %10 = tpu.matmul %8, %9, %cst {dimension_numbers = #tpu.dot_dimension_numbers<[1], [0], [0], [1], [0, 0, 1, 1], [], []>} : vector<8x32xbf16>, vector<32x64xbf16>, vector<8x64xf32> -> vector<8x64xf32>
    %c0_7 = arith.constant 0 : index
    %c0_8 = arith.constant 0 : index
    %11 = vector.load %arg10[%c0_7, %c0_8] : memref<1x64xf32, #tpu.memory_space<vmem>>, vector<1x64xf32>
    %12 = vector.broadcast %11 : vector<1x64xf32> to vector<8x64xf32>
    %13 = arith.addf %10, %12 : vector<8x64xf32>
    %cst_9 = arith.constant 0.000000e+00 : f32
    %14 = vector.broadcast %cst_9 : f32 to vector<8x64xf32>
    %15 = arith.maximumf %13, %14 : vector<8x64xf32>
    %c0_10 = arith.constant 0 : index
    %c0_11 = arith.constant 0 : index
    %16 = vector.load %arg22[%c0_10, %c0_11] : memref<8x32xf32, #tpu.memory_space<vmem>>, vector<8x32xf32>
    %17 = arith.truncf %15 : vector<8x64xf32> to vector<8x64xbf16>
    %c0_12 = arith.constant 0 : index
    %c0_13 = arith.constant 0 : index
    %18 = vector.load %arg11[%c0_12, %c0_13] : memref<64x32xbf16, #tpu.memory_space<vmem>>, vector<64x32xbf16>
    %cst_14 = arith.constant dense<0.000000e+00> : vector<8x32xf32>
    %19 = tpu.matmul %17, %18, %cst_14 {dimension_numbers = #tpu.dot_dimension_numbers<[1], [0], [0], [1], [0, 0, 1, 1], [], []>} : vector<8x64xbf16>, vector<64x32xbf16>, vector<8x32xf32> -> vector<8x32xf32>
    %20 = arith.addf %16, %19 : vector<8x32xf32>
    %c0_15 = arith.constant 0 : index
    %c0_16 = arith.constant 0 : index
    %21 = vector.load %arg22[%c0_15, %c0_16] : memref<8x32xf32, #tpu.memory_space<vmem>>, vector<8x32xf32>
    tpu.vector_store %arg22[%c0_15, %c0_16], %20 {strides = array<i32>} : memref<8x32xf32, #tpu.memory_space<vmem>>, vector<8x32xf32>,
    %c0_i32_17 = arith.constant 0 : i32
    %22 = arith.cmpi eq, %arg2, %c0_i32_17 : i32
    %23 = arith.extui %22 : i1 to i32
    %c0_i32_18 = arith.constant 0 : i32
    %24 = arith.cmpi ne, %23, %c0_i32_18 : i32
    scf.if %24 {
      %c0_19 = arith.constant 0 : index
      %c0_20 = arith.constant 0 : index
      %25 = vector.load %arg20[%c0_19, %c0_20] : memref<8x32xf32, #tpu.memory_space<vmem>>, vector<8x32xf32>
      %c0_21 = arith.constant 0 : index
      %c0_22 = arith.constant 0 : index
      %26 = vector.load %arg22[%c0_21, %c0_22] : memref<8x32xf32, #tpu.memory_space<vmem>>, vector<8x32xf32>
      %27 = arith.addf %25, %26 : vector<8x32xf32>
      %c0_23 = arith.constant 0 : index
      %c0_24 = arith.constant 0 : index
      %28 = vector.load %arg12[%c0_23, %c0_24] : memref<1x32xf32, #tpu.memory_space<vmem>>, vector<1x32xf32>
      %29 = vector.broadcast %28 : vector<1x32xf32> to vector<8x32xf32>
      %30 = arith.addf %27, %29 : vector<8x32xf32>
      %cst_25 = arith.constant dense<0.000000e+00> : vector<8xf32>
      %31 = vector.multi_reduction <add>, %30, %cst_25 [1] : vector<8x32xf32> to vector<8xf32>
      %32 = vector.shape_cast %31 : vector<8xf32> to vector<8x1xf32>
      %cst_26 = arith.constant 3.200000e+01 : f32
      %33 = vector.broadcast %cst_26 : f32 to vector<8x1xf32>
      %34 = arith.divf %32, %33 : vector<8x1xf32>
      %35 = vector.broadcast %34 : vector<8x1xf32> to vector<8x32xf32>
      %36 = arith.subf %30, %35 : vector<8x32xf32>
      %37 = arith.mulf %36, %36 : vector<8x32xf32>
      %cst_27 = arith.constant dense<0.000000e+00> : vector<8xf32>
      %38 = vector.multi_reduction <add>, %37, %cst_27 [1] : vector<8x32xf32> to vector<8xf32>
      %39 = vector.shape_cast %38 : vector<8xf32> to vector<8x1xf32>
      %cst_28 = arith.constant 3.200000e+01 : f32
      %40 = vector.broadcast %cst_28 : f32 to vector<8x1xf32>
      %41 = arith.divf %39, %40 : vector<8x1xf32>
      %42 = vector.broadcast %34 : vector<8x1xf32> to vector<8x32xf32>
      %43 = arith.subf %30, %42 : vector<8x32xf32>
      %cst_29 = arith.constant 9.99999974E-6 : f32
      %44 = vector.broadcast %cst_29 : f32 to vector<8x1xf32>
      %45 = arith.addf %41, %44 : vector<8x1xf32>
      %46 = math.rsqrt %45 : vector<8x1xf32>
      %47 = vector.broadcast %46 : vector<8x1xf32> to vector<8x32xf32>
      %48 = arith.mulf %43, %47 : vector<8x32xf32>
      %c0_30 = arith.constant 0 : index
      %c0_31 = arith.constant 0 : index
      %49 = vector.load %arg15[%c0_30, %c0_31] : memref<1x32xf32, #tpu.memory_space<vmem>>, vector<1x32xf32>
      %50 = vector.broadcast %49 : vector<1x32xf32> to vector<8x32xf32>
      %51 = arith.mulf %48, %50 : vector<8x32xf32>
      %c0_32 = arith.constant 0 : index
      %c0_33 = arith.constant 0 : index
      %52 = vector.load %arg16[%c0_32, %c0_33] : memref<1x32xf32, #tpu.memory_space<vmem>>, vector<1x32xf32>
      %53 = vector.broadcast %52 : vector<1x32xf32> to vector<8x32xf32>
      %54 = arith.addf %51, %53 : vector<8x32xf32>
      %c0_34 = arith.constant 0 : index
      %c0_35 = arith.constant 0 : index
      %c0_36 = arith.constant 0 : index
      %55 = vector.load %arg17[%c0_34, %c0_35, %c0_36] : memref<1x8x32xf32, #tpu.memory_space<vmem>>, vector<1x8x32xf32>
      %56 = vector.shape_cast %55 : vector<1x8x32xf32> to vector<8x32xf32>
      %57 = vector.shape_cast %54 : vector<8x32xf32> to vector<1x8x32xf32>
      tpu.vector_store %arg17[%c0_34, %c0_35, %c0_36], %57 {strides = array<i32>} : memref<1x8x32xf32, #tpu.memory_space<vmem>>, vector<1x8x32xf32>,
    } else {
    }
    return
  }
  func.func @transform_0(%arg0: i32, %arg1: i32, %arg2: i32) -> (i32, i32, i32) {
    %c0_i32 = arith.constant 0 : i32
    %c0_i32_0 = arith.constant 0 : i32
    %c0_i32_1 = arith.constant 0 : i32
    return %arg0, %c0_i32, %c0_i32_0 : i32, i32, i32
  }
  func.func @transform_1(%arg0: i32, %arg1: i32, %arg2: i32) -> (i32, i32, i32) {
    %c0_i32 = arith.constant 0 : i32
    %c0_i32_0 = arith.constant 0 : i32
    return %arg0, %arg1, %c0_i32 : i32, i32, i32
  }
  func.func @transform_2(%arg0: i32, %arg1: i32, %arg2: i32) -> (i32, i32, i32) {
    %c0_i32 = arith.constant 0 : i32
    %c0_i32_0 = arith.constant 0 : i32
    %c0_i32_1 = arith.constant 0 : i32
    return %arg0, %c0_i32, %c0_i32_0 : i32, i32, i32
  }
  func.func @transform_3(%arg0: i32, %arg1: i32, %arg2: i32) -> (i32, i32) {
    %c0_i32 = arith.constant 0 : i32
    %c0_i32_0 = arith.constant 0 : i32
    %c0_i32_1 = arith.constant 0 : i32
    return %c0_i32, %c0_i32_0 : i32, i32
  }
  func.func @transform_4(%arg0: i32, %arg1: i32, %arg2: i32) -> (i32, i32) {
    %c0_i32 = arith.constant 0 : i32
    %c0_i32_0 = arith.constant 0 : i32
    %c0_i32_1 = arith.constant 0 : i32
    return %c0_i32, %c0_i32_0 : i32, i32
  }
  func.func @transform_5(%arg0: i32, %arg1: i32, %arg2: i32) -> (i32, i32) {
    %c0_i32 = arith.constant 0 : i32
    %c0_i32_0 = arith.constant 0 : i32
    %c0_i32_1 = arith.constant 0 : i32
    return %c0_i32, %c0_i32_0 : i32, i32
  }
  func.func @transform_6(%arg0: i32, %arg1: i32, %arg2: i32) -> (i32, i32) {
    %c0_i32 = arith.constant 0 : i32
    %c0_i32_0 = arith.constant 0 : i32
    return %c0_i32, %arg2 : i32, i32
  }
  func.func @transform_7(%arg0: i32, %arg1: i32, %arg2: i32) -> (i32, i32) {
    %c0_i32 = arith.constant 0 : i32
    %c0_i32_0 = arith.constant 0 : i32
    return %c0_i32, %arg2 : i32, i32
  }
  func.func @transform_8(%arg0: i32, %arg1: i32, %arg2: i32) -> (i32, i32) {
    %c0_i32 = arith.constant 0 : i32
    %c0_i32_0 = arith.constant 0 : i32
    return %arg2, %c0_i32 : i32, i32
  }
  func.func @transform_9(%arg0: i32, %arg1: i32, %arg2: i32) -> (i32, i32) {
    %c0_i32 = arith.constant 0 : i32
    %c0_i32_0 = arith.constant 0 : i32
    %c0_i32_1 = arith.constant 0 : i32
    return %c0_i32, %c0_i32_0 : i32, i32
  }
  func.func @transform_10(%arg0: i32, %arg1: i32, %arg2: i32) -> (i32, i32) {
    %c0_i32 = arith.constant 0 : i32
    %c0_i32_0 = arith.constant 0 : i32
    %c0_i32_1 = arith.constant 0 : i32
    return %c0_i32, %c0_i32_0 : i32, i32
  }
  func.func @transform_11(%arg0: i32, %arg1: i32, %arg2: i32) -> (i32, i32) {
    %c0_i32 = arith.constant 0 : i32
    %c0_i32_0 = arith.constant 0 : i32
    %c0_i32_1 = arith.constant 0 : i32
    return %c0_i32, %c0_i32_0 : i32, i32
  }
  func.func @transform_12(%arg0: i32, %arg1: i32, %arg2: i32) -> (i32, i32) {
    %c0_i32 = arith.constant 0 : i32
    %c0_i32_0 = arith.constant 0 : i32
    %c0_i32_1 = arith.constant 0 : i32
    return %c0_i32, %c0_i32_0 : i32, i32
  }
  func.func @transform_13(%arg0: i32, %arg1: i32, %arg2: i32) -> (i32, i32) {
    %c0_i32 = arith.constant 0 : i32
    %c0_i32_0 = arith.constant 0 : i32
    %c0_i32_1 = arith.constant 0 : i32
    return %c0_i32, %c0_i32_0 : i32, i32
  }
  func.func @transform_14(%arg0: i32, %arg1: i32, %arg2: i32) -> (i32, i32, i32) {
    %c0_i32 = arith.constant 0 : i32
    %c0_i32_0 = arith.constant 0 : i32
    return %arg0, %arg1, %c0_i32 : i32, i32, i32
  }
}

</mosaic_0001>

<bundles_post_ra>
// kernel: tpu_custom_call.1
= control target key start
LH: loop header
LB: loop body
LE: loop exit
PB: predicated region body
PF: predicated region fallthrough
CT: control target
= control target key end

     0   :  { %s3778_s0 = inlined_call_operand.hbm [shape: bf16[2,8,32], index: 0, kind: input, shape index: {}]   ;;  %s3779_s1 = inlined_call_operand.hbm [shape: f32[2,8,32], index: 1, kind: input, shape index: {}]   ;;  %s3780_s2 = inlined_call_operand.hbm [shape: s32[2,1,8], index: 2, kind: input, shape index: {}]   ;;  %s3781_s3 = inlined_call_operand.hbm [shape: bf16[32,32], index: 3, kind: input, shape index: {}]   ;;  %s3782_s4 = inlined_call_operand.hbm [shape: bf16[32,64], index: 4, kind: input, shape index: {}]   ;;  %s3783_s5 = inlined_call_operand.hbm [shape: bf16[32,32], index: 5, kind: input, shape index: {}]   ;;  %s3784_s6 = inlined_call_operand.hbm [shape: bf16[32,64], index: 6, kind: input, shape index: {}]   ;;  %s3785_s7 = inlined_call_operand.hbm [shape: f32[1,64], index: 7, kind: input, shape index: {}]   ;;  %s3786_s8 = inlined_call_operand.hbm [shape: bf16[64,32], index: 8, kind: input, shape index: {}]   ;;  %s3787_s9 = inlined_call_operand.hbm [shape: f32[1,32], index: 9, kind: input, shape index: {}]   ;;  %s3788_s10 = inlined_call_operand.hbm [shape: f32[1,32], index: 10, kind: input, shape index: {}]   ;;  %s3789_s11 = inlined_call_operand.hbm [shape: f32[1,32], index: 11, kind: input, shape index: {}]   ;;  %s3790_s12 = inlined_call_operand.hbm [shape: f32[1,32], index: 12, kind: input, shape index: {}]   ;;  %s3791_s13 = inlined_call_operand.hbm [shape: f32[1,32], index: 13, kind: input, shape index: {}]   ;;  %s3792_s14 = inlined_call_operand.hbm [shape: f32[2,8,32], index: 14, kind: output, shape index: {}]  }
   0x1   :  { %3819 = sst [smem:[#allocation44_spill]] %s3778_s0 }
   0x2   :  { %3820 = sst [smem:[#allocation45_spill]] %s3779_s1 }
   0x3   :  { %3821 = sst [smem:[#allocation46_spill]] %s3780_s2 }
   0x4   :  { %3822 = sst [smem:[#allocation47_spill]] %s3781_s3 }
   0x5   :  { %3823 = sst [smem:[#allocation48_spill]] %s3782_s4 }
   0x6   :  { %3824 = sst [smem:[#allocation49_spill]] %s3783_s5 }
   0x7   :  { %3825 = sst [smem:[#allocation50_spill]] %s3784_s6 }
   0x8   :  { %3826 = sst [smem:[#allocation51_spill]] %s3785_s7 }
   0x9   :  { %3827 = sst [smem:[#allocation52_spill]] %s3786_s8 }
   0xa   :  { %3828 = sst [smem:[#allocation53_spill]] %s3787_s9 }
   0xb   :  { %3829 = sst [smem:[#allocation54_spill]] %s3788_s10 }
   0xc   :  { %3830 = sst [smem:[#allocation55_spill]] %s3789_s11 }
   0xd   :  { %3831 = sst [smem:[#allocation56_spill]] %s3790_s12 }
   0xe   :  { %3832 = sst [smem:[#allocation57_spill]] %s3791_s13 }
   0xf   :  { %3833 = sst [smem:[#allocation58_spill]] %s3792_s14 }
  0x10   :  { %19 = vsyncpa [#allocation8], 0 }
  0x11   :  { %21 = vsyncpa [#allocation8 + $0x1], 0 }
  0x12   :  { %22 = vsyncpa [#allocation11], 0 }
  0x13   :  { %24 = vsyncpa [#allocation11 + $0x1], 0 }
  0x14   :  { %25 = vsyncpa [#allocation14], 0 }
  0x15   :  { %26 = vsyncpa [#allocation17], 0 }
  0x16   :  { %27 = vsyncpa [#allocation20], 0 }
  0x17   :  { %28 = vsyncpa [#allocation23], 0 }
  0x18   :  { %29 = vsyncpa [#allocation26], 0 }
  0x19   :  { %30 = vsyncpa [#allocation29], 0 }
  0x1a   :  { %31 = vsyncpa [#allocation9], 0 }
  0x1b   :  { %33 = vsyncpa [#allocation9 + $0x1], 0  ;;  %s3108_s29 = smov 0   ;;  %s3110_s30 = smov 0  }
  0x1c   :  { %s3112_s15 = smov 0   ;;  %s3114_s16 = smov 0  }
  0x1d   :  { %s3116_s17 = smov 0   ;;  %s3118_s18 = smov 0  }
  0x1e LB: > { %3834 = sst [smem:[#allocation40_spill]] %s3000_s16  ;;  %s3139_s19 = sadd.s32 4294967295, %s3008_s18   ;;  %s3008_s18 = sphi %s3118_s18, %s39_s18   ;;  %s3004_s17 = sphi %s3116_s17, %s3894_s17   ;;  %s3000_s16 = sphi %s3114_s16, %s3893_s16   ;;  %s2996_s15 = sphi %s3112_s15, %s3892_s15   ;;  %s2992_s30 = sphi %s3110_s30, %s3891_s30   ;;  %s2988_s29 = sphi %s3108_s29, %s3890_s29  }
  0x1f   : > { %p2050_p0 = scmp.ge.s32.totalorder %s3008_s18, 1  ;;  %p3800_p1 = scmp.eq.s32.totalorder %s3139_s19, 0 }
  0x20   : > { %p417_p2 = scmp.lt.s32.totalorder %s3008_s18, 3  ;;  %s3010_s21 = smov [#allocation13]  }
  0x21   : > { %s429_s22 = sshll.u32 %s3010_s21, 4  ;;  %s3011_s24 = smov [#allocation16]   ;;  %s3148_s22 = int_to_ptr.vmem [resolvable:$true] %s429_s22 }
  0x22   : > { %p3144_p3 = pnand %p2050_p0, %p417_p2  ;;  %s455_s25 = sshll.u32 %s3011_s24, 4  ;;  %s3159_s25 = int_to_ptr.vmem [resolvable:$true] %s455_s25 }
  0x23   : > { %s3012_s26 = smov [#allocation19]   ;;  %s3838_s3 = sld [smem:[#allocation47_spill]] }
  0x24   : > { %s3835_s20 = scalar_select %p3144_p3, 1, 0 }
  0x25   : > { %p2325_p4 = pneg %p3144_p3  ;;  %s3161_s27 = sshll.u32 %s3012_s26, 4  ;;  %s487_s27 = int_to_ptr.vmem [resolvable:$true] %s3161_s27 }
  0x26   : > { %3836 = sst [smem:[#allocation41_spill]] %s3835_s20 }
  0x27   : > { %p3155_p6 = pnand %p2325_p4, %p3800_p1 }
  0x29   : > { %s3837_s23 = scalar_select %p3155_p6, 1, 0 }
  0x2a   : > { %s2500_s14 = scalar_lea.hbm %s3838_s3, 256  ;;  %p3171_p8 = pneg %p3155_p6 }
  0x2b   : > { %p2501_p7 = scmp.ne.s32.totalorder %s3838_s3, %s2500_s14  ;;  %p2507_p11 = scmp.lt.u32.totalorder %s2500_s14, %s3838_s3 }
  0x2c   : > { %s3839_s2 = scalar_select %p3171_p8, 1, 0 }
  0x2d   : > { %p2503_p9 = pnand %p3171_p8, %p2501_p7 }
  0x2f   : > { %p2504_p10 = pneg %p2503_p9 }
  0x31   : > { %p2509_p12 = pnand %p2507_p11, %p2504_p10 }
  0x33   : > { %2512 = shalt.err (!%p2509_p12)
}
  0x34   : > { %s2513_s16 = scalar_lea.vmem %s3148_s22, 256  ;;  %p2521_p4 = scmp.lt.s32.totalorder %s3148_s22, %s3148_s22 }
  0x35   : > { %p2514_p13 = scmp.ne.s32.totalorder %s3148_s22, %s2513_s16  ;;  %p2522_p5 = scmp.lt.s32.totalorder %s2513_s16, %s2513_s16 }
  0x37   : > { %p2516_p0 = pnand %p2514_p13, %p3171_p8  ;;  %p2523_p7 = por %p2522_p5, %p2521_p4 }
  0x39   : > { %p2517_p2 = pneg %p2516_p0 }
  0x3b   : > { %p2524_p9 = pnand %p2523_p7, %p2517_p2 }
  0x3d   : > { %2527 = shalt.err (!%p2524_p9)
}
  0x3e   : > { %s3802_s20 = smov 64   ;;  %s3804_s14 = smov 4  }
  0x3f   : > { %2328 = dma.hbm_to_vmem [thread:$0]  (!%p3155_p6), %s3838_s3, 256, %s3148_s22, [#allocation14], %s3802_s20, %s3802_s20, %s3804_s14  }
  0x40   : > { %s3840_s5 = sld [smem:[#allocation49_spill]] }
  0x46   : > { %s2528_s16 = scalar_lea.hbm %s3840_s5, 256 }
  0x47   : > { %p2529_p5 = scmp.ne.s32.totalorder %s3840_s5, %s2528_s16  ;;  %p2535_p12 = scmp.lt.u32.totalorder %s2528_s16, %s3840_s5 }
  0x49   : > { %p2531_p10 = pnand %p2529_p5, %p3171_p8 }
  0x4b   : > { %p2532_p11 = pneg %p2531_p10 }
  0x4d   : > { %p2537_p13 = pnand %p2535_p12, %p2532_p11 }
  0x4f   : > { %2540 = shalt.err (!%p2537_p13)
}
  0x50   : > { %s2541_s22 = scalar_lea.vmem %s3159_s25, 256  ;;  %p2549_p7 = scmp.lt.s32.totalorder %s3159_s25, %s3159_s25 }
  0x51   : > { %p2542_p0 = scmp.ne.s32.totalorder %s3159_s25, %s2541_s22  ;;  %p2550_p9 = scmp.lt.s32.totalorder %s2541_s22, %s2541_s22 }
  0x53   : > { %p2544_p2 = pnand %p2542_p0, %p3171_p8  ;;  %p2551_p5 = por %p2550_p9, %p2549_p7 }
  0x55   : > { %p2545_p4 = pneg %p2544_p2 }
  0x57   : > { %p2552_p10 = pnand %p2551_p5, %p2545_p4 }
  0x59   : > { %2555 = shalt.err (!%p2552_p10)
}
  0x5a   : > { %2334 = dma.hbm_to_vmem [thread:$0]  (!%p3155_p6), %s3840_s5, 256, %s3159_s25, [#allocation17], %s3802_s20, %s3802_s20, %s3804_s14  }
  0x5b   : > { %s3841_s7 = sld [smem:[#allocation51_spill]] }
  0x61   : > { %s2556_s28 = scalar_lea.hbm %s3841_s7, 16 }
  0x62   : > { %p2557_p11 = scmp.ne.s32.totalorder %s3841_s7, %s2556_s28  ;;  %p2563_p0 = scmp.lt.u32.totalorder %s2556_s28, %s3841_s7 }
  0x64   : > { %p2559_p12 = pnand %p2557_p11, %p3171_p8 }
  0x66   : > { %p2560_p13 = pneg %p2559_p12 }
  0x68   : > { %p2565_p2 = pnand %p2563_p0, %p2560_p13 }
  0x6a   : > { %2568 = shalt.err (!%p2565_p2)
}
  0x6b   : > { %s2569_s22 = scalar_lea.vmem %s487_s27, 16  ;;  %s2576_s25 = scalar_lea.vmem %s487_s27, 32 }
  0x6c   : > { %p2570_p4 = scmp.ne.s32.totalorder %s487_s27, %s2569_s22  ;;  %p2577_p5 = scmp.lt.s32.totalorder %s487_s27, %s487_s27 }
  0x6d   : > { %p2578_p10 = scmp.lt.s32.totalorder %s2576_s25, %s2569_s22 }
  0x6e   : > { %p2572_p7 = pnand %p2570_p4, %p3171_p8 }
  0x6f   : > { %p2579_p1 = por %p2578_p10, %p2577_p5 }
  0x70   : > { %p2573_p9 = pneg %p2572_p7 }
  0x72   : > { %p2580_p3 = pnand %p2579_p1, %p2573_p9 }
  0x74   : > { %2583 = shalt.err (!%p2580_p3)
}
  0x75   : > { %2340 = dma.hbm_to_vmem [thread:$0]  (!%p3155_p6), %s3841_s7, 16, %s487_s27, [#allocation20]  }
  0x76   : > { %s3015_s12 = smov [#allocation22]   ;;  %s3016_s28 = smov [#allocation25]  }
  0x77   : > { %s513_s13 = sshll.u32 %s3015_s12, 4  ;;  %s535_s21 = sshll.u32 %s3016_s28, 4  ;;  %s514_s13 = int_to_ptr.vmem [resolvable:$true] %s513_s13  ;;  %s536_s21 = int_to_ptr.vmem [resolvable:$true] %s535_s21 }
  0x78   : > { %s3842_s9 = sld [smem:[#allocation53_spill]] }
  0x7e   : > { %s2584_s16 = scalar_lea.hbm %s3842_s9, 16 }
  0x7f   : > { %p2585_p1 = scmp.ne.s32.totalorder %s3842_s9, %s2584_s16  ;;  %p2591_p12 = scmp.lt.u32.totalorder %s2584_s16, %s3842_s9 }
  0x81   : > { %p2587_p3 = pnand %p2585_p1, %p3171_p8 }
  0x83   : > { %p2588_p11 = pneg %p2587_p3 }
  0x85   : > { %p2593_p13 = pnand %p2591_p12, %p2588_p11 }
  0x87   : > { %2596 = shalt.err (!%p2593_p13)
}
  0x88   : > { %s2597_s27 = scalar_lea.vmem %s514_s13, 16  ;;  %s2604_s10 = scalar_lea.vmem %s514_s13, 32 }
  0x89   : > { %p2598_p0 = scmp.ne.s32.totalorder %s514_s13, %s2597_s27  ;;  %p2605_p7 = scmp.lt.s32.totalorder %s514_s13, %s514_s13 }
  0x8a   : > { %p2606_p9 = scmp.lt.s32.totalorder %s2604_s10, %s2597_s27 }
  0x8b   : > { %p2600_p2 = pnand %p2598_p0, %p3171_p8 }
  0x8c   : > { %p2607_p5 = por %p2606_p9, %p2605_p7 }
  0x8d   : > { %p2601_p4 = pneg %p2600_p2 }
  0x8f   : > { %p2608_p10 = pnand %p2607_p5, %p2601_p4 }
  0x91   : > { %2611 = shalt.err (!%p2608_p10)
}
  0x92   : > { %2346 = dma.hbm_to_vmem [thread:$0]  (!%p3155_p6), %s3842_s9, 16, %s514_s13, [#allocation23]  }
  0x93   : > { %s3843_s11 = sld [smem:[#allocation55_spill]] }
  0x99   : > { %s2612_s26 = scalar_lea.hbm %s3843_s11, 16 }
  0x9a   : > { %p2613_p1 = scmp.ne.s32.totalorder %s3843_s11, %s2612_s26  ;;  %p2619_p12 = scmp.lt.u32.totalorder %s2612_s26, %s3843_s11 }
  0x9c   : > { %p2615_p3 = pnand %p2613_p1, %p3171_p8 }
  0x9e   : > { %p2616_p11 = pneg %p2615_p3 }
  0xa0   : > { %p2621_p13 = pnand %p2619_p12, %p2616_p11 }
  0xa2   : > { %2624 = shalt.err (!%p2621_p13)
}
  0xa3   : > { %s2625_s27 = scalar_lea.vmem %s536_s21, 16  ;;  %s2632_s13 = scalar_lea.vmem %s536_s21, 32 }
  0xa4   : > { %p2626_p0 = scmp.ne.s32.totalorder %s536_s21, %s2625_s27  ;;  %p2633_p7 = scmp.lt.s32.totalorder %s536_s21, %s536_s21 }
  0xa5   : > { %p2634_p9 = scmp.lt.s32.totalorder %s2632_s13, %s2625_s27 }
  0xa6   : > { %p2628_p2 = pnand %p2626_p0, %p3171_p8 }
  0xa7   : > { %p2635_p5 = por %p2634_p9, %p2633_p7 }
  0xa8   : > { %p2629_p4 = pneg %p2628_p2 }
  0xaa   : > { %p2636_p10 = pnand %p2635_p5, %p2629_p4 }
  0xac   : > { %2639 = shalt.err (!%p2636_p10)
}
  0xad   : > { %2352 = dma.hbm_to_vmem [thread:$0]  (!%p3155_p6), %s3843_s11, 16, %s536_s21, [#allocation26]  }
  0xae   : > { %s2049_s28 = sadd.s32 4294967294, %s3008_s18   ;;  %s58_s20 = sadd.s32 1, %s3004_s17 }
  0xaf   : > { %s65_s24 = sadd.s32 1, %s2996_s15  ;;  %p60_p1 = scmp.ge.s32.totalorder %s58_s20, 2 }
  0xb0   : > { %p72_p3 = scmp.ne.s32.totalorder %s2996_s15, %s2992_s30  ;;  %p73_p11 = scmp.eq.s32.totalorder %s3008_s18, 0 }
  0xb1   : > { %p78_p12 = scmp.ne.s32.totalorder %s2992_s30, %s2988_s29  ;;  %s3896_s20 = smov (%p60_p1, %s58_s20), 0 }
  0xb2   : > { %3844 = sst [smem:[#allocation42_spill]] %s3896_s20  ;;  %p74_p13 = por %p73_p11, %p72_p3 }
  0xb3   : > { %p3845_p0 = scmp.eq.s32.totalorder %s3139_s19, 0  ;;  %s62_s21 = ssub.s32 %s3004_s17, %s3896_s20 }
  0xb4   : > { %p404_p4 = scmp.eq.s32.totalorder %s3139_s19, 1  ;;  %p63_p7 = scmp.eq.s32.totalorder %s62_s21, 0 }
  0xb5   : > { %p3288_p2 = por %p3845_p0, %p78_p12  ;;  %p410_p9 = scmp.eq.s32.totalorder %s2049_s28, 1 }
  0xb6   : > { %p3295_p5 = por %p404_p4, %p72_p3  ;;  %p2384_p10 = scmp.lt.s32.totalorder %s3008_s18, 2 }
  0xb7   : > { %s3846_s26 = scalar_select %p3288_p2, 1, 0 }
  0xb8   : > { %s3847_s16 = scalar_select %p3295_p5, 1, 0 }
  0xb9   : > { %s3301_s22 = scalar_select %p63_p7, %s2996_s15, %s65_s24  }
  0xba   : > { %p3303_p1 = por %p410_p9, %p78_p12  ;;  %s3308_s0 = sand.u32 1, %s2996_s15  }
  0xbb   : > { %3848 = sst [smem:[#allocation43_spill]] %s3301_s22  ;;  %p3310_p11 = pnand %p2384_p10, %p74_p13 }
  0xbc   : > { %s3849_s25 = scalar_select %p3303_p1, 1, 0 }
  0xbd   : > { %s3850_s27 = scalar_select %p3310_p11, 1, 0 }
  0xbe   : > { %s586_s13 = sand.u32 1, %s3008_s18   ;;  %s2065_s10 = sshll.u32 %s3308_s0, 3 }
  0xbf   : > { %s2066_s12 = sshll.u32 %s3004_s17, 7  ;;  %s590_s28 = scalar_lea.vmem [#allocation10], %s2065_s10 }
  0xc0   : > { %s598_s21 = sshll.u32 %s590_s28, 4  ;;  %s3851_s1 = sld [smem:[#allocation45_spill]]  ;;  %s3322_s21 = int_to_ptr.vmem [resolvable:$true] %s598_s21 }
  0xc1   : > { %s3324_s5 = scalar_lea.sflag [#allocation11], %s586_s13  ;;  %p3330_p12 = pneg %p3310_p11 }
  0xc3   : > { %s3852_s9 = scalar_select %p3330_p12, 1, 0 }
  0xc6   : > { %s3320_s3 = scalar_lea.hbm %s3851_s1, %s2066_s12  ;;  %s2645_s12 = scalar_lea.hbm %s3851_s1, 256 }
  0xc7   : > { %s2640_s7 = scalar_lea.hbm %s3320_s3, 128  ;;  %p2646_p4 = scmp.lt.u32.totalorder %s3320_s3, %s3851_s1 }
  0xc8   : > { %p2641_p3 = scmp.ne.s32.totalorder %s3320_s3, %s2640_s7  ;;  %p2647_p7 = scmp.lt.u32.totalorder %s2645_s12, %s2640_s7 }
  0xc9   : > { %p2649_p10 = scmp.lt.u32.totalorder %s2640_s7, %s3320_s3 }
  0xca   : > { %p2643_p13 = pnand %p3330_p12, %p2641_p3  ;;  %p2648_p9 = por %p2647_p7, %p2646_p4 }
  0xcc   : > { %p2644_p0 = pneg %p2643_p13  ;;  %p2650_p1 = por %p2649_p10, %p2648_p9 }
  0xce   : > { %p2651_p5 = pnand %p2650_p1, %p2644_p0 }
  0xd0   : > { %2654 = shalt.err (!%p2651_p5)
}
  0xd1   : > { %s2655_s13 = scalar_lea.vmem %s3322_s21, 128  ;;  %s3017_s14 = smov [#allocation10]  }
  0xd2   : > { %p2656_p3 = scmp.ne.s32.totalorder %s3322_s21, %s2655_s13  ;;  %s2660_s10 = sshll.u32 %s3017_s14, 4  ;;  %s2661_s10 = int_to_ptr.vmem [resolvable:$false] %s2660_s10 }
  0xd3   : > { %s2662_s28 = scalar_lea.vmem %s2661_s10, 256  ;;  %p2663_p6 = scmp.lt.s32.totalorder %s3322_s21, %s2661_s10 }
  0xd4   : > { %p2658_p13 = pnand %p2656_p3, %p3330_p12  ;;  %p2664_p8 = scmp.lt.s32.totalorder %s2662_s28, %s2655_s13 }
  0xd6   : > { %p2659_p2 = pneg %p2658_p13  ;;  %p2665_p4 = por %p2664_p8, %p2663_p6 }
  0xd8   : > { %p2666_p7 = pnand %p2665_p4, %p2659_p2 }
  0xda   : > { %2669 = shalt.err (!%p2666_p7)
}
  0xdb   : > { %2365 = dma.hbm_to_vmem [thread:$0]  (!%p3310_p11), %s3320_s3, 128, %s3322_s21, %s3324_s5  }
  0xdc   : > { %s3018_s7 = smov [#allocation15]   ;;  %s3019_s24 = smov [#allocation18]  }
  0xdd   : > { %s442_s12 = sshll.u32 %s3018_s7, 4  ;;  %s470_s1 = sshll.u32 %s3019_s24, 4  ;;  %s443_s12 = int_to_ptr.vmem [resolvable:$true] %s442_s12  ;;  %s3354_s1 = int_to_ptr.vmem [resolvable:$true] %s470_s1 }
  0xde   : > { %s3853_s4 = sld [smem:[#allocation48_spill]]  ;;  %p3854_p8 = scmp.ne.s32.totalorder %s3839_s2, 0 }
  0xe4   : > { %s2670_s13 = scalar_lea.hbm %s3853_s4, 256 }
  0xe5   : > { %p2671_p6 = scmp.ne.s32.totalorder %s3853_s4, %s2670_s13  ;;  %p2677_p1 = scmp.lt.u32.totalorder %s2670_s13, %s3853_s4 }
  0xe7   : > { %p2673_p2 = pnand %p2671_p6, %p3854_p8 }
  0xe9   : > { %p2674_p5 = pneg %p2673_p2 }
  0xeb   : > { %p2679_p0 = pnand %p2677_p1, %p2674_p5 }
  0xed   : > { %2682 = shalt.err (!%p2679_p0)
}
  0xee   : > { %s2683_s21 = scalar_lea.vmem %s443_s12, 256  ;;  %p2691_p13 = scmp.lt.s32.totalorder %s443_s12, %s443_s12 }
  0xef   : > { %p2684_p9 = scmp.ne.s32.totalorder %s443_s12, %s2683_s21  ;;  %p2692_p4 = scmp.lt.s32.totalorder %s2683_s21, %s2683_s21 }
  0xf1   : > { %p2686_p10 = pnand %p2684_p9, %p3854_p8  ;;  %p2693_p7 = por %p2692_p4, %p2691_p13 }
  0xf3   : > { %p2687_p3 = pneg %p2686_p10 }
  0xf5   : > { %p2694_p11 = pnand %p2693_p7, %p2687_p3 }
  0xf7   : > { %2697 = shalt.err (!%p2694_p11)
}
  0xf8   : > { %p3855_p6 = scmp.ne.s32.totalorder %s3837_s23, 0  ;;  %s3856_s11 = smov 4  }
  0xf9   : > { %s3857_s7 = smov 64   ;;  %s3858_s6 = sld [smem:[#allocation50_spill]] }
  0xfa   : > { %2331 = dma.hbm_to_vmem [thread:$0]  (!%p3855_p6), %s3853_s4, 256, %s443_s12, [#allocation14], %s3857_s7, %s3857_s7, %s3856_s11  }
  0xff   : > { %s2698_s13 = scalar_lea.hbm %s3858_s6, 256 }
 0x100   : > { %p2699_p2 = scmp.ne.s32.totalorder %s3858_s6, %s2698_s13  ;;  %p2705_p1 = scmp.lt.u32.totalorder %s2698_s13, %s3858_s6 }
 0x102   : > { %p2701_p11 = pnand %p2699_p2, %p3854_p8 }
 0x104   : > { %p2702_p5 = pneg %p2701_p11 }
 0x106   : > { %p2707_p0 = pnand %p2705_p1, %p2702_p5 }
 0x108   : > { %2710 = shalt.err (!%p2707_p0)
}
 0x109   : > { %s2711_s12 = scalar_lea.vmem %s3354_s1, 256  ;;  %p2719_p13 = scmp.lt.s32.totalorder %s3354_s1, %s3354_s1 }
 0x10a   : > { %p2712_p9 = scmp.ne.s32.totalorder %s3354_s1, %s2711_s12  ;;  %p2720_p4 = scmp.lt.s32.totalorder %s2711_s12, %s2711_s12 }
 0x10c   : > { %p2714_p10 = pnand %p2712_p9, %p3854_p8  ;;  %p2721_p7 = por %p2720_p4, %p2719_p13 }
 0x10e   : > { %p2715_p3 = pneg %p2714_p10 }
 0x110   : > { %p2722_p2 = pnand %p2721_p7, %p2715_p3 }
 0x112   : > { %2725 = shalt.err (!%p2722_p2)
}
 0x113   : > { %2337 = dma.hbm_to_vmem [thread:$0]  (!%p3855_p6), %s3858_s6, 256, %s3354_s1, [#allocation17], %s3857_s7, %s3857_s7, %s3856_s11  }
 0x114   : > { %s3020_s24 = smov [#allocation21]   ;;  %s3021_s10 = smov [#allocation24]  }
 0x115   : > { %s499_s14 = sshll.u32 %s3020_s24, 4  ;;  %s524_s13 = sshll.u32 %s3021_s10, 4  ;;  %s500_s14 = int_to_ptr.vmem [resolvable:$true] %s499_s14  ;;  %s3403_s13 = int_to_ptr.vmem [resolvable:$true] %s524_s13 }
 0x116   : > { %s3859_s8 = sld [smem:[#allocation52_spill]] }
 0x11c   : > { %s2726_s21 = scalar_lea.hbm %s3859_s8, 512 }
 0x11d   : > { %p2727_p11 = scmp.ne.s32.totalorder %s3859_s8, %s2726_s21  ;;  %p2733_p0 = scmp.lt.u32.totalorder %s2726_s21, %s3859_s8 }
 0x11f   : > { %p2729_p5 = pnand %p2727_p11, %p3854_p8 }
 0x121   : > { %p2730_p1 = pneg %p2729_p5 }
 0x123   : > { %p2735_p9 = pnand %p2733_p0, %p2730_p1 }
 0x125   : > { %2738 = shalt.err (!%p2735_p9)
}
 0x126   : > { %s2739_s20 = scalar_lea.vmem %s500_s14, 512  ;;  %p2747_p4 = scmp.lt.s32.totalorder %s500_s14, %s500_s14 }
 0x127   : > { %p2740_p10 = scmp.ne.s32.totalorder %s500_s14, %s2739_s20  ;;  %p2748_p7 = scmp.lt.s32.totalorder %s2739_s20, %s2739_s20 }
 0x129   : > { %p2742_p3 = pnand %p2740_p10, %p3854_p8  ;;  %p2749_p2 = por %p2748_p7, %p2747_p4 }
 0x12b   : > { %p2743_p13 = pneg %p2742_p3 }
 0x12d   : > { %p2750_p12 = pnand %p2749_p2, %p2743_p13 }
 0x12f   : > { %2753 = shalt.err (!%p2750_p12)
}
 0x130   : > { %2343 = dma.hbm_to_vmem [thread:$0]  (!%p3855_p6), %s3859_s8, 512, %s500_s14, [#allocation20], %s3857_s7, %s3857_s7, %s3856_s11  }
 0x131   : > { %s3860_s3 = sld [smem:[#allocation54_spill]] }
 0x137   : > { %s2754_s21 = scalar_lea.hbm %s3860_s3, 16 }
 0x138   : > { %p2755_p11 = scmp.ne.s32.totalorder %s3860_s3, %s2754_s21  ;;  %p2761_p1 = scmp.lt.u32.totalorder %s2754_s21, %s3860_s3 }
 0x13a   : > { %p2757_p12 = pnand %p2755_p11, %p3854_p8 }
 0x13c   : > { %p2758_p5 = pneg %p2757_p12 }
 0x13e   : > { %p2763_p0 = pnand %p2761_p1, %p2758_p5 }
 0x140   : > { %2766 = shalt.err (!%p2763_p0)
}
 0x141   : > { %s2767_s11 = scalar_lea.vmem %s3403_s13, 16  ;;  %s2774_s7 = scalar_lea.vmem %s3403_s13, 32 }
 0x142   : > { %p2768_p9 = scmp.ne.s32.totalorder %s3403_s13, %s2767_s11  ;;  %p2775_p13 = scmp.lt.s32.totalorder %s3403_s13, %s3403_s13 }
 0x143   : > { %p2776_p4 = scmp.lt.s32.totalorder %s2774_s7, %s2767_s11 }
 0x144   : > { %p2770_p10 = pnand %p2768_p9, %p3854_p8 }
 0x145   : > { %p2777_p7 = por %p2776_p4, %p2775_p13 }
 0x146   : > { %p2771_p3 = pneg %p2770_p10 }
 0x148   : > { %p2778_p2 = pnand %p2777_p7, %p2771_p3 }
 0x14a   : > { %2781 = shalt.err (!%p2778_p2)
}
 0x14b   : > { %2349 = dma.hbm_to_vmem [thread:$0]  (!%p3855_p6), %s3860_s3, 16, %s3403_s13, [#allocation23]  }
 0x14c   : > { %s3022_s24 = smov [#allocation27]   ;;  %s3023_s28 = smov [#allocation28]  }
 0x14d   : > { %s546_s10 = sshll.u32 %s3022_s24, 4  ;;  %s557_s21 = sshll.u32 %s3023_s28, 4  ;;  %s547_s10 = int_to_ptr.vmem [resolvable:$true] %s546_s10  ;;  %s3450_s21 = int_to_ptr.vmem [resolvable:$true] %s557_s21 }
 0x14e   : > { %s3861_s1 = sld [smem:[#allocation56_spill]] }
 0x154   : > { %s2782_s20 = scalar_lea.hbm %s3861_s1, 16 }
 0x155   : > { %p2783_p11 = scmp.ne.s32.totalorder %s3861_s1, %s2782_s20  ;;  %p2789_p1 = scmp.lt.u32.totalorder %s2782_s20, %s3861_s1 }
 0x157   : > { %p2785_p12 = pnand %p2783_p11, %p3854_p8 }
 0x159   : > { %p2786_p5 = pneg %p2785_p12 }
 0x15b   : > { %p2791_p0 = pnand %p2789_p1, %p2786_p5 }
 0x15d   : > { %2794 = shalt.err (!%p2791_p0)
}
 0x15e   : > { %s2795_s4 = scalar_lea.vmem %s547_s10, 16  ;;  %s2802_s24 = scalar_lea.vmem %s547_s10, 32 }
 0x15f   : > { %p2796_p9 = scmp.ne.s32.totalorder %s547_s10, %s2795_s4  ;;  %p2803_p13 = scmp.lt.s32.totalorder %s547_s10, %s547_s10 }
 0x160   : > { %p2804_p4 = scmp.lt.s32.totalorder %s2802_s24, %s2795_s4 }
 0x161   : > { %p2798_p10 = pnand %p2796_p9, %p3854_p8 }
 0x162   : > { %p2805_p7 = por %p2804_p4, %p2803_p13 }
 0x163   : > { %p2799_p3 = pneg %p2798_p10 }
 0x165   : > { %p2806_p2 = pnand %p2805_p7, %p2799_p3 }
 0x167   : > { %2809 = shalt.err (!%p2806_p2)
}
 0x168   : > { %2355 = dma.hbm_to_vmem [thread:$0]  (!%p3855_p6), %s3861_s1, 16, %s547_s10, [#allocation26]  }
 0x169   : > { %s3862_s11 = sld [smem:[#allocation57_spill]] }
 0x16f   : > { %s2810_s7 = scalar_lea.hbm %s3862_s11, 16 }
 0x170   : > { %p2811_p11 = scmp.ne.s32.totalorder %s3862_s11, %s2810_s7  ;;  %p2817_p1 = scmp.lt.u32.totalorder %s2810_s7, %s3862_s11 }
 0x172   : > { %p2813_p12 = pnand %p2811_p11, %p3854_p8 }
 0x174   : > { %p2814_p5 = pneg %p2813_p12 }
 0x176   : > { %p2819_p0 = pnand %p2817_p1, %p2814_p5 }
 0x178   : > { %2822 = shalt.err (!%p2819_p0)
}
 0x179   : > { %s2823_s10 = scalar_lea.vmem %s3450_s21, 16  ;;  %s2830_s28 = scalar_lea.vmem %s3450_s21, 32 }
 0x17a   : > { %p2824_p9 = scmp.ne.s32.totalorder %s3450_s21, %s2823_s10  ;;  %p2831_p13 = scmp.lt.s32.totalorder %s3450_s21, %s3450_s21 }
 0x17b   : > { %p2832_p4 = scmp.lt.s32.totalorder %s2830_s28, %s2823_s10 }
 0x17c   : > { %p2826_p10 = pnand %p2824_p9, %p3854_p8 }
 0x17d   : > { %p2833_p7 = por %p2832_p4, %p2831_p13 }
 0x17e   : > { %p2827_p3 = pneg %p2826_p10 }
 0x180   : > { %p2834_p2 = pnand %p2833_p7, %p2827_p3 }
 0x182   : > { %2837 = shalt.err (!%p2834_p2)
}
 0x183   : > { %2358 = dma.hbm_to_vmem [thread:$0]  (!%p3855_p6), %s3862_s11, 16, %s3450_s21, [#allocation29]  }
 0x184   : > { %s2063_s2 = sshll.u32 %s3308_s0, 2  ;;  %s2064_s20 = sshll.u32 %s3004_s17, 6 }
 0x185   : > { %s3863_s13 = sld [smem:[#allocation44_spill]]  ;;  %s572_s23 = scalar_lea.vmem [#allocation7], %s2063_s2 }
 0x186   : > { %s579_s24 = sshll.u32 %s572_s23, 4  ;;  %s569_s10 = scalar_lea.sflag [#allocation8], %s3308_s0  ;;  %s580_s24 = int_to_ptr.vmem [resolvable:$true] %s579_s24 }
 0x187   : > { %p3864_p11 = scmp.ne.s32.totalorder %s3852_s9, 0 }
 0x18b   : > { %s3499_s4 = scalar_lea.hbm %s3863_s13, %s2064_s20  ;;  %s2843_s22 = scalar_lea.hbm %s3863_s13, 128 }
 0x18c   : > { %s2838_s28 = scalar_lea.hbm %s3499_s4, 64  ;;  %p2844_p5 = scmp.lt.u32.totalorder %s3499_s4, %s3863_s13 }
 0x18d   : > { %p2839_p8 = scmp.ne.s32.totalorder %s3499_s4, %s2838_s28  ;;  %p2845_p1 = scmp.lt.u32.totalorder %s2843_s22, %s2838_s28 }
 0x18e   : > { %p2847_p9 = scmp.lt.u32.totalorder %s2838_s28, %s3499_s4 }
 0x18f   : > { %p2841_p12 = pnand %p2839_p8, %p3864_p11  ;;  %p2846_p0 = por %p2845_p1, %p2844_p5 }
 0x191   : > { %p2842_p6 = pneg %p2841_p12  ;;  %p2848_p10 = por %p2847_p9, %p2846_p0 }
 0x193   : > { %p2849_p3 = pnand %p2848_p10, %p2842_p6 }
 0x195   : > { %2852 = shalt.err (!%p2849_p3)
}
 0x196   : > { %s2853_s2 = scalar_lea.vmem %s580_s24, 64  ;;  %s3024_s14 = smov [#allocation7]  }
 0x197   : > { %p2854_p13 = scmp.ne.s32.totalorder %s580_s24, %s2853_s2  ;;  %s2858_s23 = sshll.u32 %s3024_s14, 4  ;;  %s2859_s23 = int_to_ptr.vmem [resolvable:$false] %s2858_s23 }
 0x198   : > { %s2860_s21 = scalar_lea.vmem %s2859_s23, 128  ;;  %p2861_p2 = scmp.lt.s32.totalorder %s580_s24, %s2859_s23 }
 0x199   : > { %p2856_p4 = pnand %p2854_p13, %p3864_p11  ;;  %p2862_p8 = scmp.lt.s32.totalorder %s2860_s21, %s2853_s2 }
 0x19b   : > { %p2857_p7 = pneg %p2856_p4  ;;  %p2863_p12 = por %p2862_p8, %p2861_p2 }
 0x19d   : > { %p2864_p1 = pnand %p2863_p12, %p2857_p7 }
 0x19f   : > { %2867 = shalt.err (!%p2864_p1)
}
 0x1a0   : > { %p3865_p5 = scmp.ne.s32.totalorder %s3850_s27, 0  ;;  %s2067_s28 = sshll.u32 %s3004_s17, 4 }
 0x1a1   : > { %s608_s12 = scalar_lea.vmem [#allocation12], %s3308_s0  ;;  %s3866_s14 = sld [smem:[#allocation46_spill]] }
 0x1a2   : > { %2362 = dma.hbm_to_vmem [thread:$0]  (!%p3865_p5), %s3499_s4, 64, %s580_s24, %s569_s10  }
 0x1a3   : > { %s615_s22 = sshll.u32 %s608_s12, 4  ;;  %s616_s22 = int_to_ptr.vmem [resolvable:$true] %s615_s22 }
 0x1a7   : > { %s613_s1 = scalar_lea.hbm %s3866_s14, %s2067_s28  ;;  %s2873_s3 = scalar_lea.hbm %s3866_s14, 32 }
 0x1a8   : > { %s2868_s23 = scalar_lea.hbm %s613_s1, 16  ;;  %p2874_p10 = scmp.lt.u32.totalorder %s613_s1, %s3866_s14 }
 0x1a9   : > { %p2869_p6 = scmp.ne.s32.totalorder %s613_s1, %s2868_s23  ;;  %p2875_p3 = scmp.lt.u32.totalorder %s2873_s3, %s2868_s23 }
 0x1aa   : > { %p2877_p4 = scmp.lt.u32.totalorder %s2868_s23, %s613_s1 }
 0x1ab   : > { %p2871_p0 = pnand %p2869_p6, %p3864_p11  ;;  %p2876_p13 = por %p2875_p3, %p2874_p10 }
 0x1ad   : > { %p2872_p9 = pneg %p2871_p0  ;;  %p2878_p7 = por %p2877_p4, %p2876_p13 }
 0x1af   : > { %p2879_p2 = pnand %p2878_p7, %p2872_p9 }
 0x1b1   : > { %2882 = shalt.err (!%p2879_p2)
}
 0x1b2   : > { %s2883_s0 = scalar_lea.vmem %s616_s22, 16  ;;  %s3025_s4 = smov [#allocation12]  }
 0x1b3   : > { %p2884_p8 = scmp.ne.s32.totalorder %s616_s22, %s2883_s0  ;;  %s2888_s24 = sshll.u32 %s3025_s4, 4  ;;  %s2889_s24 = int_to_ptr.vmem [resolvable:$false] %s2888_s24 }
 0x1b4   : > { %s2890_s10 = scalar_lea.vmem %s2889_s24, 32  ;;  %p2891_p6 = scmp.lt.s32.totalorder %s616_s22, %s2889_s24 }
 0x1b5   : > { %p2886_p12 = pnand %p2884_p8, %p3864_p11  ;;  %p2892_p0 = scmp.lt.s32.totalorder %s2890_s10, %s2883_s0 }
 0x1b7   : > { %p2887_p1 = pneg %p2886_p12  ;;  %p2893_p5 = por %p2892_p0, %p2891_p6 }
 0x1b9   : > { %p2894_p3 = pnand %p2893_p5, %p2887_p1 }
 0x1bb   : > { %2897 = shalt.err (!%p2894_p3)
}
 0x1bc   : > { %p3867_p10 = scmp.ne.s32.totalorder %s3850_s27, 0  ;;  %s3868_s6 = sld [smem:[#allocation41_spill]] }
 0x1be   : > { %2368 = dma.hbm_to_vmem [thread:$0]  (!%p3867_p10), %s613_s1, 16, %s616_s22, %s3324_s5  }
 0x1c2   : > { %p3869_p9 = scmp.ne.s32.totalorder %s3868_s6, 0 }
 0x1c3   : > { %s3540_s8 = sand.u32 (!%p3869_p9), 1, %s2992_s30   ;;  %p3870_p11 = scmp.ne.s32.totalorder (!%p3869_p9), %s3846_s26, 0 }
 0x1c4   : > { %624 = sbr.rel (%p3869_p9) target bundleno = 4398 (0x112e), region = 76  ;;  %s2069_s9 = sshll.u32 (!%p3869_p9), %s3540_s8, 2 }
 0x1c5   : > { %s627_s3 = scalar_lea.sflag (!%p3869_p9), [#allocation8], %s3540_s8  ;;  %s3544_s28 = scalar_lea.vmem (!%p3869_p9), [#allocation7], %s2069_s9 }
 0x1cb   : > { %2951 = dma.done.wait (%p3870_p11), %s627_s3, 64  }
 0x1cc   : > { %2953 = vsyncadd (%p3870_p11), %s627_s3, 4294967232  ;;  %s635_s5 = sand.u32 1, %s3139_s19   ;;  %s2070_s27 = sshll.u32 %s3540_s8, 3 }
 0x1cd   : > { %s636_s1 = scalar_lea.sflag [#allocation11], %s635_s5  ;;  %s3554_s12 = scalar_lea.vmem [#allocation10], %s2070_s27 }
 0x1ce   : > { %2955 = dma.done.wait (%p3870_p11), %s636_s1, 144  }
 0x1cf   : > { %2957 = vsyncadd (%p3870_p11), %s636_s1, 4294967152  ;;  %s647_s22 = scalar_lea.vmem [#allocation12], %s3540_s8  ;;  %p3871_p5 = scmp.eq.s32.totalorder %s3139_s19, 0 }
 0x1d1   : > { %2959 = dma.done.wait (%p3871_p5), [#allocation14], 512   ;;  %p3872_p13 = pmov %p3871_p5 }
 0x1d2   : > { %p3873_p4 = pmov %p3871_p5 }
 0x1d3   : > { %2961 = vsyncadd (%p3872_p13), [#allocation14], 4294966784 }
 0x1d4   : > { %2963 = dma.done.wait (%p3873_p4), [#allocation17], 512   ;;  %p3874_p7 = pmov %p3873_p4 }
 0x1d5   : > { %p3875_p2 = pmov %p3873_p4 }
 0x1d6   : > { %2965 = vsyncadd (%p3874_p7), [#allocation17], 4294966784 }
 0x1d7   : > { %2967 = dma.done.wait (%p3875_p2), [#allocation20], 528   ;;  %p3876_p8 = pmov %p3875_p2 }
 0x1d8   : > { %p3877_p12 = pmov %p3875_p2 }
 0x1d9   : > { %2969 = vsyncadd (%p3876_p8), [#allocation20], 4294966768 }
 0x1da   : > { %2971 = dma.done.wait (%p3877_p12), [#allocation23], 32   ;;  %p3878_p1 = pmov %p3875_p2 }
 0x1dc   : > { %2973 = vsyncadd (%p3878_p1), [#allocation23], 4294967264  ;;  %p3879_p6 = pmov %p3878_p1 }
 0x1dd   : > { %p3880_p0 = pmov %p3878_p1 }
 0x1de   : > { %2975 = dma.done.wait (%p3879_p6), [#allocation26], 32  }
 0x1df   : > { %2977 = vsyncadd (%p3880_p0), [#allocation26], 4294967264  ;;  %p3881_p3 = pmov %p3880_p0 }
 0x1e0   : > { %p3882_p10 = pmov %p3880_p0 }
 0x1e1   : > { %2979 = dma.done.wait (%p3881_p3), [#allocation29], 16  }
 0x1e2   : > { %2981 = vsyncadd (%p3882_p10), [#allocation29], 4294967280  ;;  %vm770_vm0 = vcmask 261120   ;;  %v3026_v0 = vmov 0.0   ;;  %vm3027_vm1 = vmmov 0   ;;  %v2464_v1 = vld [vmem:[#allocation15] sm:$0xff]   ;;  %v895_v25 = vlaneseq }
 0x1e3   : > { %2165 = vmatprep.subr.bf16.mxu0 %v3026_v0  ;;  %2169 = vmatprep.mubr.msk.bf16.mxu0 %vm3027_vm1, %v3026_v0  ;;  %900 = vst.msk [vmem:[#allocation6] sm:$0xff] %vm770_vm0, %v3026_v0  ;;  %v2465_v2 = vld [vmem:[#allocation15 + $0x8] sm:$0xff]   ;;  %v2466_v3 = vld [vmem:[#allocation13] sm:$0xff]   ;;  %v2467_v5 = vld [vmem:[#allocation13 + $0x8] sm:$0xff]   ;;  %vm815_vm2 = vcmask 257024   ;;  %s3028_s19 = smov 96  }
 0x1e4   : > { %2173 = vmatprep.subr.bf16.mxu1 %v3026_v0  ;;  %2177 = vmatprep.mubr.msk.bf16.mxu1 %vm3027_vm1, %v3026_v0  ;;  %v753_v4 = vld [vmem:[%s3544_s28] sm:$0xf]  ;;  %v3596_v6 = vld [vmem:[%s3554_s12] sm:$0xff]  ;;  %vm903_vm3 = vcmask 64512   ;;  %s3029_s26 = smov 120   ;;  %vm965_vm4 = vcmask 1043456  }
 0x1e5   : > { %2166 = vmatpush3.bf16.msra.mxu0 %v2464_v1  ;;  %2174 = vmatpush3.bf16.msra.mxu1 %v2466_v3  ;;  %v828_v7 = vpack.c.bf16 %v3596_v6, %v3596_v6  ;;  %v891_v26 = vld [vmem:[%s647_s22] sm:$0x1]  ;;  %v896_v27 = vshrl.u32 %v895_v25, 7  ;;  %v1011_v49 = vld [vmem:[#allocation16] sm:$0xf]  ;;  %s3030_s7 = smov 112  }
 0x1e6   : > { %2167 = vmatprep.subr.bf16.mxu0 %v3026_v0  ;;  %2175 = vmatprep.subr.bf16.mxu1 %v3026_v0  ;;  %vm892_vm5 = vcmp.eq.s32.totalorder %v891_v26, 1  ;;  %v1016_v50 = vsel %vm965_vm4, %v1011_v49, 0  ;;  %s3031_s20 = smov 104   ;;  %vm1708_vm6 = vcmask 523264   ;;  %s3883_s23 = sld [smem:[#allocation40_spill]] }
 0x1e7   : > { %v897_v28 = vsub.s32 0, %v896_v27  ;;  %v893_v29 = vsel %vm892_vm5, -1e+30, %v3026_v0  ;;  %s744_s21 = scalar_lea.vmem [#allocation30], %s2070_s27  ;;  %s3884_s10 = sld [smem:[#allocation58_spill]] }
 0x1e8   : > { %s1814_s0 = sshll.u32 %s744_s21, 4  ;;  %s1800_s9 = scalar_lea.sflag [#allocation9], %s3540_s8  ;;  %s3730_s0 = int_to_ptr.vmem [resolvable:$true] %s1814_s0 }
 0x1e9   : > { %2168 = vmatpush3.bf16.msra.mxu0 %v2465_v2  ;;  %2176 = vmatpush3.bf16.msra.mxu1 %v2467_v5  ;;  %v3625_v30 = vrot.slane %v893_v29, %v897_v28  ;;  %s2898_s3 = scalar_lea.vmem %s3730_s0, 128  ;;  %p3885_p11 = scmp.ne.s32.totalorder %s3847_s16, 0 }
 0x1ea   : > { %2181 = vmatprep.subr.bf16.mxu0 %v3026_v0  ;;  %2187 = vmatprep.subr.bf16.mxu1 %v3026_v0  ;;  %p2899_p9 = scmp.ne.s32.totalorder %s3730_s0, %s2898_s3  ;;  %s3032_s28 = smov [#allocation30]  }
 0x1eb   : > { %s2902_s5 = sshll.u32 %s3032_s28, 4  ;;  %s2903_s5 = int_to_ptr.vmem [resolvable:$false] %s2902_s5 }
 0x1ec   : > { %2170 = vmatmul.mubr.msk.bf16.vlgmr.msra.gmra.mrb[0].mxu0 %vm770_vm0, %v753_v4  ;;  %2178 = vmatmul.mubr.msk.bf16.vlgmr.msra.gmra.mrb[0].mxu1 %vm770_vm0, %v828_v7  ;;  %s2123_s2 = sshll.u32 %s3883_s23, 7  ;;  %p2900_p5 = pnand %p2899_p9, %p3885_p11 }
 0x1ed   : > { %2183 = vmatprep.mubr.msk.bf16.mxu0 %vm3027_vm1, %v3026_v0  ;;  %2189 = vmatprep.mubr.msk.bf16.mxu1 %vm3027_vm1, %v3026_v0  ;;  %s3728_s6 = scalar_lea.hbm %s3884_s10, %s2123_s2  ;;  %s2904_s27 = scalar_lea.vmem %s2903_s5, 256 }
 0x1ee   : > { %p2901_p13 = pneg %p2900_p5  ;;  %p2905_p4 = scmp.lt.s32.totalorder %s3730_s0, %s2903_s5 }
 0x1ef   : > { %p2906_p7 = scmp.lt.s32.totalorder %s2904_s27, %s2898_s3 }
 0x1f1   : > { %p2907_p2 = por %p2906_p7, %p2905_p4 }
 0x1f3   : > { %p2908_p8 = pnand %p2907_p2, %p2901_p13 }
 0x2bf   : > { %v808_v8 = vpop.f32.mrb[0].mxu0  ;;  %v883_v13 = vpop.f32.mrb[0].mxu1 }
 0x2c0   : > { %v814_v9 = vpack.c.bf16 %v808_v8, %v808_v8  ;;  %v2171_v10 = vpop.f32.mrb[1].mxu0  ;;  %v2179_v14 = vpop.f32.mrb[1].mxu1  ;;  %v889_v19 = vmul.f32 0.35355338, %v883_v13 }
 0x2c1   : > { %v811_v11 = vpop.f32.mrb[2].mxu0  ;;  %v886_v15 = vpop.f32.mrb[2].mxu1 }
 0x2c2   : > { %816 = vst.msk [vmem:[#allocation2] sm:$0xf] %vm815_vm2, %v814_v9  ;;  %820 = vrot.lane.b32.xlu1 %v814_v9, %s3028_s19  ;;  %v2172_v12 = vpop.f32.mrb[3].mxu0  ;;  %v2180_v16 = vpop.f32.mrb[3].mxu1  ;;  %v3613_v21 = vpack.c.bf16 %v889_v19, %v889_v19  ;;  %v1009_v9 = vld [vmem:[#allocation6] sm:$0xff] }
 0x2c9   : > { %v901_v17 = vld [vmem:[#allocation2] sm:$0xf] }
 0x2ca   : > { %v2468_v18 = vld [vmem:[#allocation2] ss:$0 sps:$4 sm:$0xff]   ;;  %v908_v20 = vsel %vm903_vm3, %v901_v17, 0 }
 0x2cb   : > { %2182 = vmatpush3.bf16.xpose.msra.mxu0 %v908_v20  ;;  %1068 = vrot.lane.b32.xlu1 %v2468_v18, %s3029_s26  ;;  %v2470_v8 = vld [vmem:[#allocation2] ss:$0 sps:$4 sm:$0xff]  }
 0x2cc   : > { %2193 = vmatprep.subr.bf16.mxu0 %v3026_v0 }
 0x2d2   : > { %2184 = vmatmul.mubr.msk.bf16.vlgmr.msra.gmra.mrb[4].mxu0 %vm903_vm3, %v3613_v21 }
 0x2d3   : > { %2195 = vmatprep.mubr.msk.bf16.mxu0 %vm3027_vm1, %v3026_v0  ;;  %2194 = vmatpush3.bf16.msra.mxu0 %v1016_v50 }
 0x2d4   : > { %2205 = vmatprep.subr.bf16.mxu0 %v3026_v0 }
 0x334   : > { %v821_v22 = vpop.permute.xlu1 %820 }
 0x335   : > { %823 = vst.msk [vmem:[#allocation3] sm:$0xf] %vm815_vm2, %v821_v22 }
 0x33c   : > { %v902_v23 = vld [vmem:[#allocation3] sm:$0xf] }
 0x33d   : > { %v967_v24 = vsel %vm965_vm4, %v902_v23, 0  ;;  %v1069_v45 = vpop.permute.xlu1 %1068  ;;  %v2469_v62 = vld [vmem:[#allocation3] ss:$0 sps:$4 sm:$0xff]   ;;  %v1181_v23 = vld [vmem:[#allocation16 + $0x4] sm:$0xf] }
 0x33e   : > { %2188 = vmatpush3.bf16.msra.mxu1 %v967_v24  ;;  %v1074_v47 = vsel %vm903_vm3, %v1069_v45, 0  ;;  %v1186_v24 = vsel %vm965_vm4, %v1181_v23, 0  ;;  %v2472_v45 = vld [vmem:[#allocation2] ss:$0 sps:$4 sm:$0xff]  }
 0x33f   : > { %2199 = vmatprep.subr.bf16.mxu1 %v3026_v0 }
 0x3a5   : > { %v944_v31 = vpop.f32.mrb[4].mxu0 }
 0x3a6   : > { %v945_v32 = vadd.f32 %v944_v31, %v3625_v30  ;;  %v2185_v33 = vpop.f32.mrb[5].mxu0 }
 0x3a7   : > { %v947_v34 = vpop.f32.mrb[6].mxu0 }
 0x3a8   : > { %v2186_v35 = vpop.f32.mrb[7].mxu0  ;;  %v950_v36 = vsel %vm903_vm3, %v945_v32, -inf }
 0x3a9   : > { %951 = vmax.xlane.f32.xlu0 %v950_v36 }
 0x436   : > { %v952_v37 = vpop.xlane.xlu0 %951 }
 0x437   : > { %v953_v38 = vsub.f32 %v945_v32, %v952_v37  ;;  %v2471_v37 = vld [vmem:[#allocation3] ss:$0 sps:$4 sm:$0xff]  }
 0x439   : > { %v954_v39 = vmul.f32 1.442695, %v953_v38 }
 0x43b   : > { %2480 = vpow2.f32 %v954_v39 }
 0x445   : > { %v2481_v40 = vpop.eup %2480 }
 0x446   : > { %v956_v41 = vsel %vm903_vm3, %v2481_v40, 0.0 }
 0x447   : > { %957 = vadd.xlane.f32.xlu0 %v956_v41 }
 0x45d   : > { %1063 = vrot.lane.b32.xlu0 %v3613_v21, %s3029_s26 }
 0x4d4   : > { %v958_v42 = vpop.xlane.xlu0 %957 }
 0x4d5   : > { %2482 = vrcp.f32 %v958_v42 }
 0x4d8   : > { %v1064_v48 = vpop.permute.xlu0 %1063 }
 0x4df   : > { %v2483_v43 = vpop.eup %2482 }
 0x4e0   : > { %v960_v44 = vmul.f32 %v2483_v43, %v2481_v40 }
 0x4e2   : > { %v961_v46 = vpack.c.bf16 %v960_v44, %v960_v44 }
 0x4e4   : > { %2190 = vmatmul.mubr.msk.bf16.vlgmr.msra.gmra.mrb[4].mxu1 %vm903_vm3, %v961_v46 }
 0x4e5   : > { %2200 = vmatpush3.bf16.xpose.msra.mxu1 %v1074_v47  ;;  %2201 = vmatprep.mubr.msk.bf16.mxu1 %vm3027_vm1, %v3026_v0 }
 0x4e6   : > { %2211 = vmatprep.subr.bf16.mxu1 %v3026_v0 }
 0x4ec   : > { %2202 = vmatmul.mubr.msk.bf16.vlgmr.msra.gmra.mrb[8].mxu1 %vm903_vm3, %v1064_v48 }
 0x4ed   : > { %2213 = vmatprep.mubr.msk.bf16.mxu1 %vm3027_vm1, %v3026_v0  ;;  %2212 = vmatpush3.bf16.msra.mxu1 %v1186_v24 }
 0x4ee   : > { %2223 = vmatprep.subr.bf16.mxu1 %v3026_v0 }
 0x5b7   : > { %v1003_v51 = vpop.f32.mrb[4].mxu1 }
 0x5b8   : > { %v1010_v52 = vpack.c.bf16 %v1003_v51, %v1003_v51  ;;  %v2191_v53 = vpop.f32.mrb[5].mxu1 }
 0x5b9   : > { %v1006_v54 = vpop.f32.mrb[6].mxu1 }
 0x5ba   : > { %v2192_v55 = vpop.f32.mrb[7].mxu1  ;;  %2196 = vmatmul.mubr.msk.bf16.vlgmr.msra.gmra.mrb[8].mxu0 %vm903_vm3, %v1010_v52 }
 0x5bb   : > { %2207 = vmatprep.mubr.msk.bf16.mxu0 %vm3027_vm1, %v3026_v0 }
 0x5bf   : > { %v1110_v56 = vpop.f32.mrb[8].mxu1 }
 0x5c0   : > { %v1111_v57 = vadd.f32 %v1110_v56, %v3625_v30  ;;  %v2203_v58 = vpop.f32.mrb[9].mxu1 }
 0x5c1   : > { %v1113_v59 = vpop.f32.mrb[10].mxu1  ;;  %v1350_v58 = vld [vmem:[#allocation16 + $0x8] sm:$0xf] }
 0x5c2   : > { %v2204_v60 = vpop.f32.mrb[11].mxu1  ;;  %v1116_v61 = vsel %vm903_vm3, %v1111_v57, -inf  ;;  %v1355_v59 = vsel %vm965_vm4, %v1350_v58, 0 }
 0x5c3   : > { %1117 = vmax.xlane.f32.xlu1 %v1116_v61 }
 0x5d4   : > { %1131 = vrot.lane.b32.xlu1 %v2469_v62, %s3029_s26 }
 0x5d8   : > { %1232 = vrot.lane.b32.xlu1 %v3613_v21, %s3030_s7 }
 0x650   : > { %v1118_v63 = vpop.xlane.xlu1 %1117 }
 0x651   : > { %v1119_v1 = vsub.f32 %v1111_v57, %v1118_v63 }
 0x653   : > { %v1120_v2 = vmul.f32 1.442695, %v1119_v1 }
 0x654   : > { %v1132_v3 = vpop.permute.xlu1 %1131 }
 0x655   : > { %2484 = vpow2.f32 %v1120_v2  ;;  %v1137_v4 = vsel %vm965_vm4, %v1132_v3, 0 }
 0x656   : > { %2206 = vmatpush3.bf16.msra.mxu0 %v1137_v4 }
 0x657   : > { %2217 = vmatprep.subr.bf16.mxu0 %v3026_v0 }
 0x658   : > { %v1233_v22 = vpop.permute.xlu1 %1232 }
 0x65f   : > { %v2485_v5 = vpop.eup %2484 }
 0x660   : > { %v1122_v7 = vsel %vm903_vm3, %v2485_v5, 0.0 }
 0x661   : > { %1123 = vadd.xlane.f32.xlu0 %v1122_v7 }
 0x677   : > { %1237 = vrot.lane.b32.xlu0 %v2470_v8, %s3030_s7 }
 0x68d   : > { %v1052_v10 = vpop.f32.mrb[8].mxu0 }
 0x68e   : > { %v1058_v11 = vadd.f32 %v1052_v10, %v1009_v9  ;;  %v2197_v12 = vpop.f32.mrb[9].mxu0  ;;  %v2473_v9 = vld [vmem:[#allocation3] ss:$0 sps:$4 sm:$0xff]  }
 0x68f   : > { %v1055_v13 = vpop.f32.mrb[10].mxu0 }
 0x690   : > { %1059 = vst.msk [vmem:[#allocation6] sm:$0xff] %vm770_vm0, %v1058_v11  ;;  %v2198_v14 = vpop.f32.mrb[11].mxu0 }
 0x697   : > { %v1179_v46 = vld [vmem:[#allocation6] sm:$0xff] }
 0x6ee   : > { %v1124_v15 = vpop.xlane.xlu0 %1123 }
 0x6ef   : > { %2486 = vrcp.f32 %v1124_v15 }
 0x6f2   : > { %v1238_v18 = vpop.permute.xlu0 %1237 }
 0x6f3   : > { %v1243_v20 = vsel %vm903_vm3, %v1238_v18, 0 }
 0x6f9   : > { %v2487_v16 = vpop.eup %2486 }
 0x6fa   : > { %v1126_v17 = vmul.f32 %v2487_v16, %v2485_v5  ;;  %v1519_v16 = vld [vmem:[#allocation16 + $0xc] sm:$0xf] }
 0x6fc   : > { %v1127_v19 = vpack.c.bf16 %v1126_v17, %v1126_v17  ;;  %v1524_v17 = vsel %vm965_vm4, %v1519_v16, 0  ;;  %v2119_v16 = vld [vmem:[#allocation22] ss:$0 sm:$0xff] }
 0x6fe   : > { %2208 = vmatmul.mubr.msk.bf16.vlgmr.msra.gmra.mrb[12].mxu0 %vm903_vm3, %v1127_v19 }
 0x6ff   : > { %2218 = vmatpush3.bf16.xpose.msra.mxu0 %v1243_v20  ;;  %2219 = vmatprep.mubr.msk.bf16.mxu0 %vm3027_vm1, %v3026_v0 }
 0x700   : > { %2229 = vmatprep.subr.bf16.mxu0 %v3026_v0 }
 0x706   : > { %2220 = vmatmul.mubr.msk.bf16.vlgmr.msra.gmra.mrb[16].mxu0 %vm903_vm3, %v1233_v22 }
 0x707   : > { %2231 = vmatprep.mubr.msk.bf16.mxu0 %vm3027_vm1, %v3026_v0  ;;  %2230 = vmatpush3.bf16.msra.mxu0 %v1355_v59 }
 0x708   : > { %2241 = vmatprep.subr.bf16.mxu0 %v3026_v0 }
 0x7d1   : > { %v1173_v25 = vpop.f32.mrb[12].mxu0 }
 0x7d2   : > { %v1180_v26 = vpack.c.bf16 %v1173_v25, %v1173_v25  ;;  %v2209_v27 = vpop.f32.mrb[13].mxu0 }
 0x7d3   : > { %v1176_v28 = vpop.f32.mrb[14].mxu0 }
 0x7d4   : > { %v2210_v29 = vpop.f32.mrb[15].mxu0  ;;  %2214 = vmatmul.mubr.msk.bf16.vlgmr.msra.gmra.mrb[12].mxu1 %vm903_vm3, %v1180_v26 }
 0x7d5   : > { %2225 = vmatprep.mubr.msk.bf16.mxu1 %vm3027_vm1, %v3026_v0 }
 0x7d9   : > { %v1279_v31 = vpop.f32.mrb[16].mxu0 }
 0x7da   : > { %v1280_v32 = vadd.f32 %v1279_v31, %v3625_v30  ;;  %v2221_v33 = vpop.f32.mrb[17].mxu0 }
 0x7db   : > { %v1282_v34 = vpop.f32.mrb[18].mxu0 }
 0x7dc   : > { %v2222_v35 = vpop.f32.mrb[19].mxu0  ;;  %v1285_v36 = vsel %vm903_vm3, %v1280_v32, -inf }
 0x7dd   : > { %1286 = vmax.xlane.f32.xlu1 %v1285_v36 }
 0x7ee   : > { %1300 = vrot.lane.b32.xlu1 %v2471_v37, %s3030_s7 }
 0x7f2   : > { %1401 = vrot.lane.b32.xlu1 %v3613_v21, %s3031_s20 }
 0x86a   : > { %v1287_v38 = vpop.xlane.xlu1 %1286 }
 0x86b   : > { %v1288_v39 = vsub.f32 %v1280_v32, %v1287_v38 }
 0x86d   : > { %v1289_v40 = vmul.f32 1.442695, %v1288_v39 }
 0x86e   : > { %v1301_v41 = vpop.permute.xlu1 %1300 }
 0x86f   : > { %2488 = vpow2.f32 %v1289_v40  ;;  %v1306_v42 = vsel %vm965_vm4, %v1301_v41, 0 }
 0x870   : > { %2224 = vmatpush3.bf16.msra.mxu1 %v1306_v42 }
 0x871   : > { %2235 = vmatprep.subr.bf16.mxu1 %v3026_v0 }
 0x872   : > { %v1402_v57 = vpop.permute.xlu1 %1401 }
 0x879   : > { %v2489_v43 = vpop.eup %2488 }
 0x87a   : > { %v1291_v44 = vsel %vm903_vm3, %v2489_v43, 0.0 }
 0x87b   : > { %1292 = vadd.xlane.f32.xlu0 %v1291_v44 }
 0x891   : > { %1406 = vrot.lane.b32.xlu0 %v2472_v45, %s3031_s20 }
 0x8a7   : > { %v1222_v47 = vpop.f32.mrb[12].mxu1 }
 0x8a8   : > { %v1228_v21 = vadd.f32 %v1222_v47, %v1179_v46  ;;  %v2215_v48 = vpop.f32.mrb[13].mxu1 }
 0x8a9   : > { %v1225_v49 = vpop.f32.mrb[14].mxu1  ;;  %v2474_v48 = vld [vmem:[#allocation18] sm:$0xff]  }
 0x8aa   : > { %1229 = vst.msk [vmem:[#allocation6] sm:$0xff] %vm770_vm0, %v1228_v21  ;;  %v2216_v50 = vpop.f32.mrb[15].mxu1  ;;  %v2475_v49 = vld [vmem:[#allocation18 + $0x8] sm:$0xff]  }
 0x8ab   : > { %v2477_v50 = vld [vmem:[#allocation21 + $0x8] sm:$0xff]  }
 0x8b1   : > { %v1348_v18 = vld [vmem:[#allocation6] sm:$0xff] }
 0x908   : > { %v1293_v51 = vpop.xlane.xlu0 %1292 }
 0x909   : > { %2490 = vrcp.f32 %v1293_v51 }
 0x90c   : > { %v1407_v54 = vpop.permute.xlu0 %1406 }
 0x90d   : > { %v1412_v56 = vsel %vm903_vm3, %v1407_v54, 0 }
 0x913   : > { %v2491_v52 = vpop.eup %2490 }
 0x914   : > { %v1295_v53 = vmul.f32 %v2491_v52, %v2489_v43 }
 0x916   : > { %v1296_v55 = vpack.c.bf16 %v1295_v53, %v1295_v53 }
 0x918   : > { %2226 = vmatmul.mubr.msk.bf16.vlgmr.msra.gmra.mrb[16].mxu1 %vm903_vm3, %v1296_v55  ;;  %v2108_v55 = vld [vmem:[#allocation24] ss:$0 sm:$0xff] }
 0x919   : > { %2236 = vmatpush3.bf16.xpose.msra.mxu1 %v1412_v56  ;;  %2237 = vmatprep.mubr.msk.bf16.mxu1 %vm3027_vm1, %v3026_v0 }
 0x91a   : > { %2247 = vmatprep.subr.bf16.mxu1 %v3026_v0 }
 0x920   : > { %2238 = vmatmul.mubr.msk.bf16.vlgmr.msra.gmra.mrb[20].mxu1 %vm903_vm3, %v1402_v57  ;;  %v2109_v57 = vld [vmem:[#allocation25] ss:$0 sm:$0xff] }
 0x921   : > { %2249 = vmatprep.mubr.msk.bf16.mxu1 %vm3027_vm1, %v3026_v0  ;;  %2248 = vmatpush3.bf16.msra.mxu1 %v1524_v17 }
 0x922   : > { %2261 = vmatprep.subr.bf16.mxu1 %v3026_v0 }
 0x9eb   : > { %v1342_v60 = vpop.f32.mrb[16].mxu1 }
 0x9ec   : > { %v1349_v61 = vpack.c.bf16 %v1342_v60, %v1342_v60  ;;  %v2227_v62 = vpop.f32.mrb[17].mxu1 }
 0x9ed   : > { %v1345_v63 = vpop.f32.mrb[18].mxu1  ;;  %v2478_v62 = vld [vmem:[#allocation21 + $0x10] sm:$0xff]  }
 0x9ee   : > { %v2228_v1 = vpop.f32.mrb[19].mxu1  ;;  %2232 = vmatmul.mubr.msk.bf16.vlgmr.msra.gmra.mrb[20].mxu0 %vm903_vm3, %v1349_v61  ;;  %v2479_v63 = vld [vmem:[#allocation21 + $0x18] sm:$0xff]  }
 0x9ef   : > { %2243 = vmatprep.mubr.msk.bf16.mxu0 %vm3027_vm1, %v3026_v0  ;;  %v2110_v1 = vld [vmem:[#allocation19] ss:$0 sm:$0xff] }
 0x9f3   : > { %v1448_v2 = vpop.f32.mrb[20].mxu1 }
 0x9f4   : > { %v1449_v3 = vadd.f32 %v1448_v2, %v3625_v30  ;;  %v2239_v4 = vpop.f32.mrb[21].mxu1 }
 0x9f5   : > { %v1451_v5 = vpop.f32.mrb[22].mxu1 }
 0x9f6   : > { %v2240_v7 = vpop.f32.mrb[23].mxu1  ;;  %v1454_v8 = vsel %vm903_vm3, %v1449_v3, -inf }
 0x9f7   : > { %1455 = vmax.xlane.f32.xlu1 %v1454_v8 }
 0xa08   : > { %1469 = vrot.lane.b32.xlu1 %v2473_v9, %s3031_s20 }
 0xa84   : > { %v1456_v10 = vpop.xlane.xlu1 %1455 }
 0xa85   : > { %v1457_v11 = vsub.f32 %v1449_v3, %v1456_v10 }
 0xa87   : > { %v1458_v12 = vmul.f32 1.442695, %v1457_v11 }
 0xa88   : > { %v1470_v13 = vpop.permute.xlu1 %1469 }
 0xa89   : > { %2492 = vpow2.f32 %v1458_v12  ;;  %v1475_v14 = vsel %vm965_vm4, %v1470_v13, 0 }
 0xa8a   : > { %2242 = vmatpush3.bf16.msra.mxu0 %v1475_v14 }
 0xa8b   : > { %2253 = vmatprep.subr.bf16.mxu0 %v3026_v0 }
 0xa93   : > { %v2493_v30 = vpop.eup %2492 }
 0xa94   : > { %v1460_v15 = vsel %vm903_vm3, %v2493_v30, 0.0 }
 0xa95   : > { %1461 = vadd.xlane.f32.xlu0 %v1460_v15 }
 0xac1   : > { %v1391_v19 = vpop.f32.mrb[20].mxu0 }
 0xac2   : > { %v1397_v20 = vadd.f32 %v1391_v19, %v1348_v18  ;;  %v2233_v22 = vpop.f32.mrb[21].mxu0 }
 0xac3   : > { %v1394_v23 = vpop.f32.mrb[22].mxu0 }
 0xac4   : > { %1398 = vst.msk [vmem:[#allocation6] sm:$0xff] %vm770_vm0, %v1397_v20  ;;  %v2234_v24 = vpop.f32.mrb[23].mxu0 }
 0xacb   : > { %v1517_v35 = vld [vmem:[#allocation6] sm:$0xff] }
 0xb22   : > { %v1462_v25 = vpop.xlane.xlu0 %1461 }
 0xb23   : > { %2494 = vrcp.f32 %v1462_v25 }
 0xb2d   : > { %v2495_v26 = vpop.eup %2494 }
 0xb2e   : > { %v1464_v27 = vmul.f32 %v2495_v26, %v2493_v30 }
 0xb30   : > { %v1465_v28 = vpack.c.bf16 %v1464_v27, %v1464_v27 }
 0xb32   : > { %2244 = vmatmul.mubr.msk.bf16.vlgmr.msra.gmra.mrb[24].mxu0 %vm903_vm3, %v1465_v28 }
 0xb33   : > { %2257 = vmatprep.mubr.msk.bf16.mxu0 %vm3027_vm1, %v3026_v0  ;;  %2254 = vmatpush3.bf16.msra.mxu0 %v2474_v48 }
 0xb34   : > { %2255 = vmatprep.subr.bf16.mxu0 %v3026_v0 }
 0xb37   : > { %2256 = vmatpush3.bf16.msra.mxu0 %v2475_v49 }
 0xc05   : > { %v1511_v29 = vpop.f32.mrb[24].mxu0 }
 0xc06   : > { %v1518_v31 = vpack.c.bf16 %v1511_v29, %v1511_v29  ;;  %v2245_v32 = vpop.f32.mrb[25].mxu0 }
 0xc07   : > { %v1514_v33 = vpop.f32.mrb[26].mxu0 }
 0xc08   : > { %v2246_v34 = vpop.f32.mrb[27].mxu0  ;;  %2250 = vmatmul.mubr.msk.bf16.vlgmr.msra.gmra.mrb[24].mxu1 %vm903_vm3, %v1518_v31  ;;  %v2120_v31 = vld [vmem:[#allocation27] ss:$0 sm:$0xff]  ;;  %v2121_v33 = vld [vmem:[#allocation28] ss:$0 sm:$0xff] }
 0xc09   : > { %2269 = vmatprep.mubr.msk.bf16.mxu1 %vm3027_vm1, %v3026_v0 }
 0xcdb   : > { %v1560_v36 = vpop.f32.mrb[24].mxu1 }
 0xcdc   : > { %v1566_v37 = vadd.f32 %v1560_v36, %v1517_v35  ;;  %v2251_v38 = vpop.f32.mrb[25].mxu1 }
 0xcdd   : > { %v1563_v39 = vpop.f32.mrb[26].mxu1 }
 0xcde   : > { %1567 = vst.msk [vmem:[#allocation6] sm:$0xff] %vm770_vm0, %v1566_v37  ;;  %v2252_v40 = vpop.f32.mrb[27].mxu1 }
 0xce5   : > { %v1568_v41 = vld [vmem:[#allocation6] sm:$0xff] }
 0xce6   : > { %v1569_v42 = vadd.f32 %v1568_v41, %v3596_v6  ;;  %1604 = vst.msk [vmem:[#allocation6] sm:$0xff] %vm770_vm0, %v3026_v0  ;;  %v2476_v6 = vld [vmem:[#allocation21] sm:$0xff]  }
 0xce7   : > { %2262 = vmatpush3.bf16.msra.mxu1 %v2476_v6 }
 0xce8   : > { %v1570_v43 = vsel %vm770_vm0, %v1569_v42, 0.0  ;;  %2263 = vmatprep.subr.bf16.mxu1 %v3026_v0 }
 0xce9   : > { %1571 = vadd.xlane.f32.xlu0 %v1570_v43 }
 0xceb   : > { %2264 = vmatpush3.bf16.msra.mxu1 %v2477_v50 }
 0xcec   : > { %2265 = vmatprep.subr.bf16.mxu1 %v3026_v0 }
 0xced   : > { %v1674_v10 = vld [vmem:[#allocation6] sm:$0xff] }
 0xcef   : > { %2266 = vmatpush3.bf16.msra.mxu1 %v2478_v62 }
 0xcf0   : > { %2267 = vmatprep.subr.bf16.mxu1 %v3026_v0 }
 0xcf3   : > { %2268 = vmatpush3.bf16.msra.mxu1 %v2479_v63 }
 0xd76   : > { %v1572_v44 = vpop.xlane.xlu0 %1571 }
 0xd77   : > { %v1574_v45 = vmul.f32 0.03125, %v1572_v44 }
 0xd79   : > { %v1575_v46 = vsub.f32 %v1569_v42, %v1574_v45 }
 0xd7b   : > { %v1576_v47 = vmul.f32 %v1575_v46, %v1575_v46 }
 0xd7d   : > { %v1577_v21 = vsel %vm770_vm0, %v1576_v47, 0.0 }
 0xd7e   : > { %1578 = vadd.xlane.f32.xlu0 %v1577_v21 }
 0xe0b   : > { %v1579_v51 = vpop.xlane.xlu0 %1578 }
 0xe0c   : > { %v1580_v52 = vmul.f32 0.03125, %v1579_v51 }
 0xe0e   : > { %v1581_v53 = vadd.f32 1e-05, %v1580_v52 }
 0xe10   : > { %2496 = vrsqrt.f32 %v1581_v53 }
 0xe1a   : > { %v2497_v54 = vpop.eup %2496 }
 0xe1b   : > { %v1583_v56 = vmul.f32 %v2497_v54, %v1575_v46 }
 0xe1d   : > { %v1591_v58 = vmul.f32 %v2108_v55, %v1583_v56 }
 0xe1f   : > { %v1599_v59 = vadd.f32 %v2109_v57, %v1591_v58 }
 0xe21   : > { %1600 = vst.msk [vmem:[#allocation4] sm:$0xff] %vm770_vm0, %v1599_v59  ;;  %v1601_v60 = vpack.c.bf16 %v1599_v59, %v1599_v59 }
 0xe23   : > { %1603 = vst.msk [vmem:[#allocation5] sm:$0xf] %vm815_vm2, %v1601_v60 }
 0xe28   : > { %v1757_v30 = vld [vmem:[#allocation4] sm:$0xff] }
 0xe2a   : > { %v1605_v61 = vld [vmem:[#allocation5] sm:$0xf] }
 0xe2b   : > { %2258 = vmatmul.mubr.msk.bf16.vlgmr.msra.gmra.mrb[28].mxu0 %vm770_vm0, %v1605_v61 }
 0xefe   : > { %v1667_v2 = vpop.f32.mrb[28].mxu0 }
 0xeff   : > { %v1668_v3 = vadd.f32 %v2110_v1, %v1667_v2  ;;  %v2259_v4 = vpop.f32.mrb[29].mxu0 }
 0xf00   : > { %v1670_v5 = vpop.f32.mrb[30].mxu0 }
 0xf01   : > { %v1673_v7 = vmax.f32 %v1668_v3, 0.0  ;;  %v2260_v8 = vpop.f32.mrb[31].mxu0 }
 0xf03   : > { %v1675_v9 = vpack.c.bf16 %v1673_v7, %v1673_v7 }
 0xf05   : > { %2270 = vmatmul.mubr.msk.bf16.vlgmr.msra.gmra.mrb[28].mxu1 %vm1708_vm6, %v1675_v9 }
 0xfd8   : > { %v1746_v11 = vpop.f32.mrb[28].mxu1 }
 0xfd9   : > { %v1752_v12 = vadd.f32 %v1746_v11, %v1674_v10  ;;  %v2271_v13 = vpop.f32.mrb[29].mxu1 }
 0xfda   : > { %v1749_v14 = vpop.f32.mrb[30].mxu1 }
 0xfdb   : > { %1753 = vst.msk [vmem:[#allocation6] sm:$0xff] %vm770_vm0, %v1752_v12  ;;  %v2272_v0 = vpop.f32.mrb[31].mxu1 }
 0xfe2   : > { %v1758_v15 = vld [vmem:[#allocation6] sm:$0xff] }
 0xfe3   : > { %v1759_v17 = vadd.f32 %v1758_v15, %v1757_v30 }
 0xfe5   : > { %v1767_v18 = vadd.f32 %v2119_v16, %v1759_v17 }
 0xfe7   : > { %v1768_v19 = vsel %vm770_vm0, %v1767_v18, 0.0 }
 0xfe8   : > { %1769 = vadd.xlane.f32.xlu0 %v1768_v19 }
0x1075   : > { %v1770_v20 = vpop.xlane.xlu0 %1769 }
0x1076   : > { %v1772_v22 = vmul.f32 0.03125, %v1770_v20 }
0x1078   : > { %v1773_v23 = vsub.f32 %v1767_v18, %v1772_v22 }
0x107a   : > { %v1774_v24 = vmul.f32 %v1773_v23, %v1773_v23 }
0x107c   : > { %v1775_v25 = vsel %vm770_vm0, %v1774_v24, 0.0 }
0x107d   : > { %1776 = vadd.xlane.f32.xlu1 %v1775_v25 }
0x110a   : > { %v1777_v26 = vpop.xlane.xlu1 %1776 }
0x110b   : > { %v1778_v27 = vmul.f32 0.03125, %v1777_v26 }
0x110d   : > { %v1779_v28 = vadd.f32 1e-05, %v1778_v27 }
0x110f   : > { %2498 = vrsqrt.f32 %v1779_v28 }
0x1119   : > { %v2499_v29 = vpop.eup %2498 }
0x111a   : > { %v1781_v32 = vmul.f32 %v2499_v29, %v1773_v23 }
0x111c   : > { %v1789_v34 = vmul.f32 %v2120_v31, %v1781_v32 }
0x111e   : > { %v1797_v35 = vadd.f32 %v2121_v33, %v1789_v34 }
0x1120   : > { %1798 = vst.msk [vmem:[%s744_s21] sm:$0xff] %vm770_vm0, %v1797_v35 }
0x1121   : > { %2911 = shalt.err (!%p2908_p8)
}
0x1122   : > { %s2912_s8 = scalar_lea.hbm %s3728_s6, 128  ;;  %s2916_s22 = scalar_lea.hbm %s3884_s10, 256 }
0x1123   : > { %p2913_p12 = scmp.ne.s32.totalorder %s3728_s6, %s2912_s8  ;;  %p2917_p0 = scmp.lt.u32.totalorder %s3728_s6, %s3884_s10 }
0x1124   : > { %p2918_p3 = scmp.lt.u32.totalorder %s2916_s22, %s2912_s8  ;;  %p2920_p9 = scmp.lt.u32.totalorder %s2912_s8, %s3728_s6 }
0x1125   : > { %p2914_p1 = pnand %p2913_p12, %p3885_p11 }
0x1126   : > { %p2919_p10 = por %p2918_p3, %p2917_p0 }
0x1127   : > { %p2915_p6 = pneg %p2914_p1 }
0x1128   : > { %p2921_p5 = por %p2920_p9, %p2919_p10 }
0x112a   : > { %p2922_p13 = pnand %p2921_p5, %p2915_p6 }
0x112c   : > { %2925 = shalt.err (!%p2922_p13)
}
0x112d   : > { %2323 = dma.vmem_to_hbm [thread:$0]  (%p3885_p11), %s3730_s0, 128, %s3728_s6, %s1800_s9  }
0x112e PF: > { %s1826_s7 = sand.u32 1, %s2988_s29   ;;  %p3886_p4 = scmp.ne.s32.totalorder %s3849_s25, 0 }
0x112f   : > { %p3887_p7 = scmp.ge.s32.totalorder %s3008_s18, 2  ;;  %s1827_s20 = scalar_lea.sflag [#allocation9], %s1826_s7 }
0x1131   : > { %p2370_p2 = pnand %p3887_p7, %p3886_p4 }
0x1133   : > { %2983 = dma.done.wait (!%p2370_p2), %s1827_s20, 128  }
0x1134   : > { %2985 = vsyncadd (!%p2370_p2), %s1827_s20, 4294967168  ;;  %s39_s18 = sadd.s32 1, %s3008_s18   ;;  %s3888_s16 = sld [smem:[#allocation43_spill]] }
0x1135   : > { %p36_p8 = scmp.ge.s32.totalorder %s39_s18, 4   ;;  %s3889_s23 = sld [smem:[#allocation42_spill]] }
0x1136   : > { %s3890_s29 = smov %s2992_s30  ;;  %s3891_s30 = smov %s2996_s15 }
0x1137   :  { %38 = sbr.rel (!%p36_p8) target bundleno = 30 (0x1e), region = 204 }
0x113a   : > { %s3892_s15 = smov %s3888_s16  ;;  %s3893_s16 = smov %s3004_s17 }
0x113b   : > { %s3894_s17 = smov %s3889_s23 }
0x113e   :  { %1832 = vsyncpa [#allocation8], 1 }
0x113f   :  { %1834 = vsyncpa [#allocation8 + $0x1], 1 }
0x1140   :  { %1835 = vsyncpa [#allocation11], 1 }
0x1141   :  { %1837 = vsyncpa [#allocation11 + $0x1], 1 }
0x1142   :  { %1838 = vsyncpa [#allocation14], 1 }
0x1143   :  { %1839 = vsyncpa [#allocation17], 1 }
0x1144   :  { %1840 = vsyncpa [#allocation20], 1 }
0x1145   :  { %1841 = vsyncpa [#allocation23], 1 }
0x1146   :  { %1842 = vsyncpa [#allocation26], 1 }
0x1147   :  { %1843 = vsyncpa [#allocation29], 1 }
0x1148   :  { %1844 = vsyncpa [#allocation9], 1 }
0x1149   :  { %1846 = vsyncpa [#allocation9 + $0x1], 1 }

</bundles_post_ra>
